<compile_context>
chip_gen: v6e
topology: v6e:2x2x1
jax: 0.10.0
libtpu: 0.0.40
codegen_flags: <defaults>
</compile_context>

<pallas_src>
import jax
import jax.numpy as jnp
from jax.experimental import pallas as pl
from jax.experimental.pallas import tpu as pltpu

B = 64              # batch fixed by the module's .view(64, 1, 28, 28)
K_IN = 100          # latent dim
K_PAD = 128         # latent dim padded inside the kernel (MXU-aligned K)
H1, H2, H3 = 128, 256, 512
N_OUT = 28 * 28     # 784


def generator_kernel(x_ref, w1_ref, w2_ref, w3_ref, w4_ref, b_ref,
                     out_ref, xpad_ref):
    # ---- in-kernel latent pad 100 -> 128 (no standalone XLA pad op) ----
    # Zero the scratch (pad lanes must be exactly 0), then masked-store x.
    xpad_ref[...] = jnp.zeros_like(xpad_ref)
    xpad_ref[:, 0:K_IN] = x_ref[...]

    # Layer 1: (64,128) x (128,128) -> 128, ReLU.  bf16 operands, f32 acc.
    h = jnp.dot(xpad_ref[...].astype(jnp.bfloat16), w1_ref[...],
                preferred_element_type=jnp.float32)
    h = jnp.maximum(h + b_ref[0:1, 0:H1], 0.0)

    # Layer 2: 128 -> 256, ReLU
    h = jnp.dot(h.astype(jnp.bfloat16), w2_ref[...],
                preferred_element_type=jnp.float32)
    h = jnp.maximum(h + b_ref[1:2, 0:H2], 0.0)

    # Layer 3: 256 -> 512, ReLU
    h = jnp.dot(h.astype(jnp.bfloat16), w3_ref[...],
                preferred_element_type=jnp.float32)
    h = jnp.maximum(h + b_ref[2:3, 0:H3], 0.0)

    # Layer 4: 512 -> 784, Tanh.  Output written at its true width; only the
    # last 16-lane column of each row-group is a masked store.
    o = jnp.dot(h.astype(jnp.bfloat16), w4_ref[...],
                preferred_element_type=jnp.float32)
    out_ref[...] = jnp.tanh(o + b_ref[3:4, :])


def generator_forward(x, params):
    """x: (64, 100) float32 -> (64, 1, 28, 28) float32 (NCHW, as in PyTorch)."""
    w1, w2, w3, w4, b_all = params
    assert x.shape == (B, K_IN), x.shape

    weight_bytes = 2 * (K_PAD * H1 + H1 * H2 + H2 * H3 + H3 * N_OUT)  # bf16
    bytes_accessed = (weight_bytes
                      + 4 * B * K_IN          # x (f32)
                      + 4 * 4 * N_OUT         # packed biases (f32)
                      + 4 * B * N_OUT)        # output (f32)
    flops = 2 * B * (K_PAD * H1 + H1 * H2 + H2 * H3 + H3 * N_OUT)

    vmem = pl.BlockSpec(memory_space=pltpu.MemorySpace.VMEM)
    flat = pl.pallas_call(
        generator_kernel,
        out_shape=jax.ShapeDtypeStruct((B, N_OUT), jnp.float32),
        in_specs=[vmem] * 6,
        out_specs=vmem,
        scratch_shapes=[pltpu.VMEM((B, K_PAD), jnp.float32)],
        cost_estimate=pl.CostEstimate(
            flops=flops,
            transcendentals=B * N_OUT,        # tanh
            bytes_accessed=bytes_accessed),
    )(x, w1, w2, w3, w4, b_all)

    # The module's .view(64, 1, 28, 28): contiguous reshape, free.
    return flat.reshape(B, 1, 28, 28)


def init_params(key):
    """Deterministic synthetic init matching the PyTorch layer shapes.

    Weights are stored as (in, out) (transposed vs PyTorch's (out, in)) and
    cast to bfloat16.  W1 is zero-padded along in (100 -> 128); W4 stays at
    its true (512, 784).  Biases are packed into a single (4, 784) f32 array,
    row i holding layer i's bias in its leading lanes (zeros elsewhere).
    """
    dims = [(K_IN, H1), (H1, H2), (H2, H3), (H3, N_OUT)]
    pad_in = [K_PAD - K_IN, 0, 0, 0]

    weights = []
    b_all = jnp.zeros((4, N_OUT), jnp.float32)
    for i, (fan_in, fan_out) in enumerate(dims):
        key, kw, kb = jax.random.split(key, 3)
        bound = 1.0 / jnp.sqrt(fan_in)
        w = jax.random.uniform(kw, (fan_in, fan_out), jnp.float32, -bound, bound)
        b = jax.random.uniform(kb, (fan_out,), jnp.float32, -bound, bound)
        w = jnp.pad(w, ((0, pad_in[i]), (0, 0))).astype(jnp.bfloat16)
        weights.append(w)
        b_all = b_all.at[i, :fan_out].set(b)
    w1, w2, w3, w4 = weights
    return (w1, w2, w3, w4, b_all)


def reference_forward(x, params):
    """Pure-JAX reference using the same bf16 weights / f32 accumulation."""
    w1, w2, w3, w4, b_all = params
    h = jnp.pad(x, ((0, 0), (0, K_PAD - K_IN)))
    h = jnp.maximum(jnp.dot(h.astype(jnp.bfloat16), w1,
                            preferred_element_type=jnp.float32)
                    + b_all[0:1, 0:H1], 0.0)
    h = jnp.maximum(jnp.dot(h.astype(jnp.bfloat16), w2,
                            preferred_element_type=jnp.float32)
                    + b_all[1:2, 0:H2], 0.0)
    h = jnp.maximum(jnp.dot(h.astype(jnp.bfloat16), w3,
                            preferred_element_type=jnp.float32)
                    + b_all[2:3, 0:H3], 0.0)
    o = jnp.tanh(jnp.dot(h.astype(jnp.bfloat16), w4,
                         preferred_element_type=jnp.float32)
                 + b_all[3:4, :])
    return o.reshape(B, 1, 28, 28)


if __name__ == "__main__":
    key = jax.random.PRNGKey(0)
    key, kx = jax.random.split(key)

    # Batch is fixed at 64 by the module's .view(64, 1, 28, 28); latent dim 100.
    x = jax.random.normal(kx, (B, K_IN), dtype=jnp.float32)
    params = init_params(key)

    out = generator_forward(x, params)
    out = jax.block_until_ready(out)

    assert out.shape == (64, 1, 28, 28), out.shape
    assert out.dtype == jnp.float32, out.dtype

    ref = reference_forward(x, params)
    # bf16 weight storage -> loosened tolerance vs an f32-exact check.
    assert jnp.allclose(out, ref, atol=1e-3, rtol=1e-3), "mismatch vs reference"

    print("KERNEL_OK")
</pallas_src>

<mosaic_0001>
module attributes {stable_mosaic.version = 11 : i64} {
  func.func @generator_kernel(%arg0: memref<64x100xf32, #tpu.memory_space<vmem>>, %arg1: memref<128x128xbf16, #tpu.memory_space<vmem>>, %arg2: memref<128x256xbf16, #tpu.memory_space<vmem>>, %arg3: memref<256x512xbf16, #tpu.memory_space<vmem>>, %arg4: memref<512x784xbf16, #tpu.memory_space<vmem>>, %arg5: memref<4x784xf32, #tpu.memory_space<vmem>>, %arg6: memref<64x784xf32, #tpu.memory_space<vmem>>, %arg7: memref<64x128xf32, #tpu.memory_space<vmem>>) attributes {dimension_semantics = [], scalar_prefetch = 0 : i64, scratch_operands = 1 : i64, tpu.core_type = #tpu.core_type<tc>} {
    %cst = arith.constant 0.000000e+00 : f32
    %0 = vector.broadcast %cst : f32 to vector<64x128xf32>
    %c0 = arith.constant 0 : index
    %c0_0 = arith.constant 0 : index
    %1 = vector.load %arg7[%c0, %c0_0] : memref<64x128xf32, #tpu.memory_space<vmem>>, vector<64x128xf32>
    tpu.vector_store %arg7[%c0, %c0_0], %0 {strides = array<i32>} : memref<64x128xf32, #tpu.memory_space<vmem>>, vector<64x128xf32>,
    %c0_1 = arith.constant 0 : index
    %c0_2 = arith.constant 0 : index
    %2 = vector.load %arg0[%c0_1, %c0_2] : memref<64x100xf32, #tpu.memory_space<vmem>>, vector<64x100xf32>
    %c0_3 = arith.constant 0 : index
    %c0_4 = arith.constant 0 : index
    %3 = vector.load %arg7[%c0_3, %c0_4] : memref<64x128xf32, #tpu.memory_space<vmem>>, vector<64x100xf32>
    tpu.vector_store %arg7[%c0_3, %c0_4], %2 {strides = array<i32>} : memref<64x128xf32, #tpu.memory_space<vmem>>, vector<64x100xf32>,
    %c0_5 = arith.constant 0 : index
    %c0_6 = arith.constant 0 : index
    %4 = vector.load %arg7[%c0_5, %c0_6] : memref<64x128xf32, #tpu.memory_space<vmem>>, vector<64x128xf32>
    %5 = arith.truncf %4 : vector<64x128xf32> to vector<64x128xbf16>
    %c0_7 = arith.constant 0 : index
    %c0_8 = arith.constant 0 : index
    %6 = vector.load %arg1[%c0_7, %c0_8] : memref<128x128xbf16, #tpu.memory_space<vmem>>, vector<128x128xbf16>
    %cst_9 = arith.constant dense<0.000000e+00> : vector<64x128xf32>
    %7 = tpu.matmul %5, %6, %cst_9 {dimension_numbers = #tpu.dot_dimension_numbers<[1], [0], [0], [1], [0, 0, 1, 1], [], []>} : vector<64x128xbf16>, vector<128x128xbf16>, vector<64x128xf32> -> vector<64x128xf32>
    %c0_10 = arith.constant 0 : index
    %c0_11 = arith.constant 0 : index
    %8 = vector.load %arg5[%c0_10, %c0_11] : memref<4x784xf32, #tpu.memory_space<vmem>>, vector<1x128xf32>
    %9 = vector.broadcast %8 : vector<1x128xf32> to vector<64x128xf32>
    %10 = arith.addf %7, %9 : vector<64x128xf32>
    %cst_12 = arith.constant 0.000000e+00 : f32
    %11 = vector.broadcast %cst_12 : f32 to vector<64x128xf32>
    %12 = arith.maximumf %10, %11 : vector<64x128xf32>
    %13 = arith.truncf %12 : vector<64x128xf32> to vector<64x128xbf16>
    %c0_13 = arith.constant 0 : index
    %c0_14 = arith.constant 0 : index
    %14 = vector.load %arg2[%c0_13, %c0_14] : memref<128x256xbf16, #tpu.memory_space<vmem>>, vector<128x256xbf16>
    %cst_15 = arith.constant dense<0.000000e+00> : vector<64x256xf32>
    %15 = tpu.matmul %13, %14, %cst_15 {dimension_numbers = #tpu.dot_dimension_numbers<[1], [0], [0], [1], [0, 0, 1, 1], [], []>} : vector<64x128xbf16>, vector<128x256xbf16>, vector<64x256xf32> -> vector<64x256xf32>
    %c1 = arith.constant 1 : index
    %c0_16 = arith.constant 0 : index
    %16 = vector.load %arg5[%c1, %c0_16] : memref<4x784xf32, #tpu.memory_space<vmem>>, vector<1x256xf32>
    %17 = vector.broadcast %16 : vector<1x256xf32> to vector<64x256xf32>
    %18 = arith.addf %15, %17 : vector<64x256xf32>
    %cst_17 = arith.constant 0.000000e+00 : f32
    %19 = vector.broadcast %cst_17 : f32 to vector<64x256xf32>
    %20 = arith.maximumf %18, %19 : vector<64x256xf32>
    %21 = arith.truncf %20 : vector<64x256xf32> to vector<64x256xbf16>
    %c0_18 = arith.constant 0 : index
    %c0_19 = arith.constant 0 : index
    %22 = vector.load %arg3[%c0_18, %c0_19] : memref<256x512xbf16, #tpu.memory_space<vmem>>, vector<256x512xbf16>
    %cst_20 = arith.constant dense<0.000000e+00> : vector<64x512xf32>
    %23 = tpu.matmul %21, %22, %cst_20 {dimension_numbers = #tpu.dot_dimension_numbers<[1], [0], [0], [1], [0, 0, 1, 1], [], []>} : vector<64x256xbf16>, vector<256x512xbf16>, vector<64x512xf32> -> vector<64x512xf32>
    %c2 = arith.constant 2 : index
    %c0_21 = arith.constant 0 : index
    %24 = vector.load %arg5[%c2, %c0_21] : memref<4x784xf32, #tpu.memory_space<vmem>>, vector<1x512xf32>
    %25 = vector.broadcast %24 : vector<1x512xf32> to vector<64x512xf32>
    %26 = arith.addf %23, %25 : vector<64x512xf32>
    %cst_22 = arith.constant 0.000000e+00 : f32
    %27 = vector.broadcast %cst_22 : f32 to vector<64x512xf32>
    %28 = arith.maximumf %26, %27 : vector<64x512xf32>
    %29 = arith.truncf %28 : vector<64x512xf32> to vector<64x512xbf16>
    %c0_23 = arith.constant 0 : index
    %c0_24 = arith.constant 0 : index
    %30 = vector.load %arg4[%c0_23, %c0_24] : memref<512x784xbf16, #tpu.memory_space<vmem>>, vector<512x784xbf16>
    %cst_25 = arith.constant dense<0.000000e+00> : vector<64x784xf32>
    %31 = tpu.matmul %29, %30, %cst_25 {dimension_numbers = #tpu.dot_dimension_numbers<[1], [0], [0], [1], [0, 0, 1, 1], [], []>} : vector<64x512xbf16>, vector<512x784xbf16>, vector<64x784xf32> -> vector<64x784xf32>
    %c3 = arith.constant 3 : index
    %c0_26 = arith.constant 0 : index
    %32 = vector.load %arg5[%c3, %c0_26] : memref<4x784xf32, #tpu.memory_space<vmem>>, vector<1x784xf32>
    %33 = vector.broadcast %32 : vector<1x784xf32> to vector<64x784xf32>
    %34 = arith.addf %31, %33 : vector<64x784xf32>
    %35 = math.tanh %34 : vector<64x784xf32>
    %c0_27 = arith.constant 0 : index
    %c0_28 = arith.constant 0 : index
    %36 = vector.load %arg6[%c0_27, %c0_28] : memref<64x784xf32, #tpu.memory_space<vmem>>, vector<64x784xf32>
    tpu.vector_store %arg6[%c0_27, %c0_28], %35 {strides = array<i32>} : memref<64x784xf32, #tpu.memory_space<vmem>>, vector<64x784xf32>,
    return
  }
}

</mosaic_0001>

<bundles_post_ra>
// kernel: tpu_custom_call.1
= control target key start
LH: loop header
LB: loop body
LE: loop exit
PB: predicated region body
PF: predicated region fallthrough
CT: control target
= control target key end

     0   :  { %v4177_v2 = vmov 0.0   ;;  %vm41_vm0 = vcmask 818176   ;;  %v4178_v45 = vmov 0   ;;  %s5474_s0 = inlined_call_operand.vmem [shape: f32[64,100], index: 0, kind: input, shape index: {}]   ;;  %s5475_s1 = inlined_call_operand.vmem [shape: bf16[128,128], index: 1, kind: input, shape index: {}]   ;;  %s5476_s2 = inlined_call_operand.vmem [shape: bf16[128,256], index: 2, kind: input, shape index: {}]   ;;  %s5477_s3 = inlined_call_operand.vmem [shape: bf16[256,512], index: 3, kind: input, shape index: {}]   ;;  %s5478_s4 = inlined_call_operand.vmem [shape: bf16[512,784], index: 4, kind: input, shape index: {}]   ;;  %s5479_s5 = inlined_call_operand.vmem [shape: f32[4,784], index: 5, kind: input, shape index: {}]   ;;  %s5480_s6 = inlined_call_operand.hbm [shape: f32[64,784], index: 6, kind: output, shape index: {}]  }
   0x1   :  { %v3595_v0 = vld [vmem:[%s5475_s1 + $0x38] sm:$0xff]   ;;  %v3596_v1 = vld [vmem:[%s5475_s1 + $0x30] sm:$0xff]   ;;  %25 = vst [vmem:[#allocation2] sm:$0xff] %v4177_v2  ;;  %26 = vst [vmem:[#allocation2 + $0x8] sm:$0xff] %v4177_v2  ;;  %349 = vmatprep.mubr.bf16.mxu1 %v4178_v45 }
   0x2   :  { %27 = vst [vmem:[#allocation2 + $0x10] sm:$0xff] %v4177_v2  ;;  %28 = vst [vmem:[#allocation2 + $0x18] sm:$0xff] %v4177_v2  ;;  %3566 = vmatprep.subr.bf16.mxu0 %v3595_v0  ;;  %v3597_v3 = vld [vmem:[%s5475_s1 + $0x28] sm:$0xff]   ;;  %v3598_v4 = vld [vmem:[%s5475_s1 + $0x20] sm:$0xff]  }
   0x3   :  { %29 = vst [vmem:[#allocation2 + $0x20] sm:$0xff] %v4177_v2  ;;  %30 = vst [vmem:[#allocation2 + $0x28] sm:$0xff] %v4177_v2  ;;  %3567 = vmatpush3.bf16.msra.mxu0 %v3595_v0  ;;  %v33_v5 = vld [vmem:[%s5474_s0] sm:$0xff]  ;;  %v34_v6 = vld [vmem:[%s5474_s0 + $0x8] sm:$0xff] }
   0x4   :  { %31 = vst [vmem:[#allocation2 + $0x30] sm:$0xff] %v4177_v2  ;;  %32 = vst [vmem:[#allocation2 + $0x38] sm:$0xff] %v4177_v2  ;;  %3568 = vmatprep.subr.bf16.mxu0 %v3596_v1  ;;  %v35_v7 = vld [vmem:[%s5474_s0 + $0x10] sm:$0xff]  ;;  %v36_v8 = vld [vmem:[%s5474_s0 + $0x18] sm:$0xff] }
   0x5   :  { %42 = vst.msk [vmem:[#allocation2] sm:$0xff] %vm41_vm0, %v33_v5  ;;  %43 = vst.msk [vmem:[#allocation2 + $0x8] sm:$0xff] %vm41_vm0, %v34_v6  ;;  %v37_v9 = vld [vmem:[%s5474_s0 + $0x20] sm:$0xff]  ;;  %v38_v10 = vld [vmem:[%s5474_s0 + $0x28] sm:$0xff] }
   0x6   :  { %44 = vst.msk [vmem:[#allocation2 + $0x10] sm:$0xff] %vm41_vm0, %v35_v7  ;;  %v3599_v11 = vld [vmem:[%s5475_s1 + $0x18] sm:$0xff]   ;;  %45 = vst.msk [vmem:[#allocation2 + $0x18] sm:$0xff] %vm41_vm0, %v36_v8  ;;  %v39_v12 = vld [vmem:[%s5474_s0 + $0x30] sm:$0xff] }
   0x7   :  { %3569 = vmatpush3.bf16.msra.mxu0 %v3596_v1  ;;  %46 = vst.msk [vmem:[#allocation2 + $0x20] sm:$0xff] %vm41_vm0, %v37_v9  ;;  %47 = vst.msk [vmem:[#allocation2 + $0x28] sm:$0xff] %vm41_vm0, %v38_v10  ;;  %v40_v13 = vld [vmem:[%s5474_s0 + $0x38] sm:$0xff]  ;;  %v3606_v16 = vld [vmem:[%s5476_s2 + $0x64] ss:$8 sps:$4 sm:$0xff]  }
   0x8   :  { %3570 = vmatprep.subr.bf16.mxu0 %v3597_v3  ;;  %48 = vst.msk [vmem:[#allocation2 + $0x30] sm:$0xff] %vm41_vm0, %v39_v12  ;;  %49 = vst.msk [vmem:[#allocation2 + $0x38] sm:$0xff] %vm41_vm0, %v40_v13  ;;  %v3603_v14 = vld [vmem:[%s5476_s2 + $0x74] ss:$8 sps:$4 sm:$0xff]   ;;  %v3605_v15 = vld [vmem:[%s5476_s2 + $0x70] ss:$8 sps:$4 sm:$0xff]  }
   0x9   :  { %317 = vmatprep.subr.bf16.mxu1 %v3603_v14  ;;  %v3608_v17 = vld [vmem:[%s5476_s2 + $0x60] ss:$8 sps:$4 sm:$0xff]   ;;  %v3600_v18 = vld [vmem:[%s5475_s1 + $0x10] sm:$0xff]   ;;  %v3612_v25 = vld [vmem:[%s5476_s2 + $0x44] ss:$8 sps:$4 sm:$0xff]  }
   0xa   :  { %318 = vmatpush1.bf16.msra.mxu1 %v3605_v15  ;;  %v3609_v21 = vld [vmem:[%s5476_s2 + $0x54] ss:$8 sps:$4 sm:$0xff]   ;;  %v3611_v23 = vld [vmem:[%s5476_s2 + $0x50] ss:$8 sps:$4 sm:$0xff]   ;;  %v3601_v24 = vld [vmem:[%s5475_s1 + $0x8] sm:$0xff]  }
   0xb   :  { %3571 = vmatpush3.bf16.msra.mxu0 %v3597_v3  ;;  %319 = vmatprep.subr.bf16.mxu1 %v3606_v16  ;;  %v3614_v26 = vld [vmem:[%s5476_s2 + $0x40] ss:$8 sps:$4 sm:$0xff]   ;;  %v3615_v27 = vld [vmem:[%s5476_s2 + $0x34] ss:$8 sps:$4 sm:$0xff]   ;;  %v3617_v29 = vld [vmem:[%s5476_s2 + $0x30] ss:$8 sps:$4 sm:$0xff]  }
   0xc   :  { %3572 = vmatprep.subr.bf16.mxu0 %v3598_v4  ;;  %v50_v19 = vld [vmem:[#allocation2] sm:$0xff]  ;;  %v51_v20 = vld [vmem:[#allocation2 + $0x8] sm:$0xff]  ;;  %v3621_v41 = vld [vmem:[%s5476_s2 + $0x14] ss:$8 sps:$4 sm:$0xff]  }
   0xd   :  { %v58_v22 = vpack.c.bf16 %v51_v20, %v50_v19  ;;  %v3602_v28 = vld [vmem:[%s5475_s1] sm:$0xff]   ;;  %v52_v30 = vld [vmem:[#allocation2 + $0x10] sm:$0xff]  ;;  %v53_v31 = vld [vmem:[#allocation2 + $0x18] sm:$0xff] }
   0xe   :  { %320 = vmatpush1.bf16.msra.mxu1 %v3608_v17  ;;  %v54_v32 = vld [vmem:[#allocation2 + $0x20] sm:$0xff]  ;;  %v55_v33 = vld [vmem:[#allocation2 + $0x28] sm:$0xff]  ;;  %v59_v34 = vpack.c.bf16 %v53_v31, %v52_v30  ;;  %v3623_v42 = vld [vmem:[%s5476_s2 + $0x10] ss:$8 sps:$4 sm:$0xff]  }
   0xf   :  { %3573 = vmatpush3.bf16.msra.mxu0 %v3598_v4  ;;  %3582 = vmatprep.mubr.bf16.mxu0 %v58_v22  ;;  %v60_v35 = vpack.c.bf16 %v55_v33, %v54_v32  ;;  %v56_v36 = vld [vmem:[#allocation2 + $0x30] sm:$0xff]  ;;  %v57_v37 = vld [vmem:[#allocation2 + $0x38] sm:$0xff]  ;;  %v3618_v39 = vld [vmem:[%s5476_s2 + $0x24] ss:$8 sps:$4 sm:$0xff]  }
  0x10   :  { %3574 = vmatprep.subr.bf16.mxu0 %v3599_v11  ;;  %321 = vmatprep.subr.bf16.mxu1 %v3609_v21  ;;  %v61_v38 = vpack.c.bf16 %v57_v37, %v56_v36  ;;  %v3620_v40 = vld [vmem:[%s5476_s2 + $0x20] ss:$8 sps:$4 sm:$0xff]   ;;  %v3624_v43 = vld [vmem:[%s5476_s2 + $0x4] ss:$8 sps:$4 sm:$0xff]  }
  0x11   :  { %v3626_v44 = vld [vmem:[%s5476_s2] ss:$8 sps:$4 sm:$0xff]  }
  0x12   :  { %322 = vmatpush1.bf16.msra.mxu1 %v3611_v23 }
  0x13   :  { %3575 = vmatpush3.bf16.msra.mxu0 %v3599_v11  ;;  %323 = vmatprep.subr.bf16.mxu1 %v3612_v25 }
  0x14   :  { %3576 = vmatprep.subr.bf16.mxu0 %v3600_v18 }
  0x16   :  { %324 = vmatpush1.bf16.msra.mxu1 %v3614_v26 }
  0x17   :  { %3577 = vmatpush3.bf16.msra.mxu0 %v3600_v18  ;;  %325 = vmatprep.subr.bf16.mxu1 %v3615_v27 }
  0x18   :  { %3578 = vmatprep.subr.bf16.mxu0 %v3601_v24 }
  0x1a   :  { %326 = vmatpush1.bf16.msra.mxu1 %v3617_v29 }
  0x1b   :  { %3579 = vmatpush3.bf16.msra.mxu0 %v3601_v24  ;;  %327 = vmatprep.subr.bf16.mxu1 %v3618_v39 }
  0x1c   :  { %3580 = vmatprep.subr.bf16.mxu0 %v3602_v28 }
  0x1e   :  { %328 = vmatpush1.bf16.msra.mxu1 %v3620_v40 }
  0x1f   :  { %3581 = vmatpush3.bf16.msra.mxu0 %v3602_v28  ;;  %329 = vmatprep.subr.bf16.mxu1 %v3621_v41 }
  0x22   :  { %3583 = vmatmul.mubr.bf16.vlgmr.msra.gmra.mxu0 %v59_v34  ;;  %330 = vmatpush1.bf16.msra.mxu1 %v3623_v42 }
  0x23   :  { %3586 = vmatprep.mubr.bf16.mxu0 %v60_v35  ;;  %331 = vmatprep.subr.bf16.mxu1 %v3624_v43 }
  0x26   :  { %332 = vmatpush1.bf16.msra.mxu1 %v3626_v44 }
  0x2a   :  { %3587 = vmatmul.mubr.bf16.gmra.mxu0 %v61_v38 }
  0x2b   :  { %11 = vsyncpa [#allocation4], 0  ;;  %v3627_v46 = vld [vmem:[%s5477_s3 + $0xe0] ss:$16 sps:$4 sm:$0xff]   ;;  %v3629_v47 = vld [vmem:[%s5477_s3 + $0xe4] ss:$16 sps:$4 sm:$0xff]  }
  0x2c   :  { %v3632_v48 = vld [vmem:[%s5477_s3 + $0xec] ss:$16 sps:$4 sm:$0xff]   ;;  %v3635_v49 = vld [vmem:[%s5477_s3 + $0xc4] ss:$16 sps:$4 sm:$0xff]   ;;  %821 = vmatprep.subr.bf16.mxu0 %v3629_v47  ;;  %v3633_v50 = vld [vmem:[%s5477_s3 + $0xc0] ss:$16 sps:$4 sm:$0xff]  }
  0x2d   :  { %894 = vmatprep.subr.bf16.mxu1 %v3632_v48  ;;  %822 = vmatpush1.bf16.msra.mxu0 %v3627_v46  ;;  %v3641_v51 = vld [vmem:[%s5477_s3 + $0xa4] ss:$16 sps:$4 sm:$0xff]   ;;  %v3639_v52 = vld [vmem:[%s5477_s3 + $0xa0] ss:$16 sps:$4 sm:$0xff]   ;;  %v3630_v20 = vld [vmem:[%s5477_s3 + $0xe8] ss:$16 sps:$4 sm:$0xff]  }
  0x2e   :  { %823 = vmatprep.subr.bf16.mxu0 %v3635_v49  ;;  %v3647_v53 = vld [vmem:[%s5477_s3 + $0x84] ss:$16 sps:$4 sm:$0xff]   ;;  %v3645_v54 = vld [vmem:[%s5477_s3 + $0x80] ss:$16 sps:$4 sm:$0xff]   ;;  %v3638_v23 = vld [vmem:[%s5477_s3 + $0xcc] ss:$16 sps:$4 sm:$0xff]  }
  0x2f   :  { %v3653_v55 = vld [vmem:[%s5477_s3 + $0x64] ss:$16 sps:$4 sm:$0xff]   ;;  %v3651_v56 = vld [vmem:[%s5477_s3 + $0x60] ss:$16 sps:$4 sm:$0xff]   ;;  %v3636_v27 = vld [vmem:[%s5477_s3 + $0xc8] ss:$16 sps:$4 sm:$0xff]  }
  0x30   :  { %v3659_v57 = vld [vmem:[%s5477_s3 + $0x44] ss:$16 sps:$4 sm:$0xff]   ;;  %v3657_v58 = vld [vmem:[%s5477_s3 + $0x40] ss:$16 sps:$4 sm:$0xff]   ;;  %v3644_v29 = vld [vmem:[%s5477_s3 + $0xac] ss:$16 sps:$4 sm:$0xff]  }
  0x31   :  { %824 = vmatpush1.bf16.msra.mxu0 %v3633_v50  ;;  %v3665_v59 = vld [vmem:[%s5477_s3 + $0x24] ss:$16 sps:$4 sm:$0xff]   ;;  %v3663_v60 = vld [vmem:[%s5477_s3 + $0x20] ss:$16 sps:$4 sm:$0xff]   ;;  %v3642_v33 = vld [vmem:[%s5477_s3 + $0xa8] ss:$16 sps:$4 sm:$0xff]  }
  0x32   :  { %825 = vmatprep.subr.bf16.mxu0 %v3641_v51  ;;  %v3671_v61 = vld [vmem:[%s5477_s3 + $0x4] ss:$16 sps:$4 sm:$0xff]   ;;  %v3669_v62 = vld [vmem:[%s5477_s3] ss:$16 sps:$4 sm:$0xff]   ;;  %v3650_v35 = vld [vmem:[%s5477_s3 + $0x8c] ss:$16 sps:$4 sm:$0xff]  }
  0x33   :  { %v3677_v63 = vld [vmem:[%s5477_s3 + $0x1e4] ss:$16 sps:$4 sm:$0xff]   ;;  %v3675_v0 = vld [vmem:[%s5477_s3 + $0x1e0] ss:$16 sps:$4 sm:$0xff]   ;;  %v3648_v38 = vld [vmem:[%s5477_s3 + $0x88] ss:$16 sps:$4 sm:$0xff]  }
  0x34   :  { %v3683_v1 = vld [vmem:[%s5477_s3 + $0x1c4] ss:$16 sps:$4 sm:$0xff]   ;;  %v3681_v2 = vld [vmem:[%s5477_s3 + $0x1c0] ss:$16 sps:$4 sm:$0xff]   ;;  %v3656_v39 = vld [vmem:[%s5477_s3 + $0x6c] ss:$16 sps:$4 sm:$0xff]  }
  0x35   :  { %826 = vmatpush1.bf16.msra.mxu0 %v3639_v52  ;;  %v3689_v3 = vld [vmem:[%s5477_s3 + $0x1a4] ss:$16 sps:$4 sm:$0xff]   ;;  %v3687_v4 = vld [vmem:[%s5477_s3 + $0x1a0] ss:$16 sps:$4 sm:$0xff]   ;;  %v3654_v43 = vld [vmem:[%s5477_s3 + $0x68] ss:$16 sps:$4 sm:$0xff]  }
  0x36   :  { %827 = vmatprep.subr.bf16.mxu0 %v3647_v53  ;;  %v3695_v5 = vld [vmem:[%s5477_s3 + $0x184] ss:$16 sps:$4 sm:$0xff]   ;;  %v3693_v6 = vld [vmem:[%s5477_s3 + $0x180] ss:$16 sps:$4 sm:$0xff]   ;;  %v3662_v44 = vld [vmem:[%s5477_s3 + $0x4c] ss:$16 sps:$4 sm:$0xff]  }
  0x37   :  { %v3701_v7 = vld [vmem:[%s5477_s3 + $0x164] ss:$16 sps:$4 sm:$0xff]   ;;  %v3699_v8 = vld [vmem:[%s5477_s3 + $0x160] ss:$16 sps:$4 sm:$0xff]   ;;  %v3660_v48 = vld [vmem:[%s5477_s3 + $0x48] ss:$16 sps:$4 sm:$0xff]  }
  0x38   :  { %v3158_v11 = vld [vmem:[%s5479_s5] ss:$0 sm:$0xff]  ;;  %v3668_v49 = vld [vmem:[%s5477_s3 + $0x2c] ss:$16 sps:$4 sm:$0xff]   ;;  %v3666_v51 = vld [vmem:[%s5477_s3 + $0x28] ss:$16 sps:$4 sm:$0xff]  }
  0x39   :  { %828 = vmatpush1.bf16.msra.mxu0 %v3645_v54  ;;  %v3672_v52 = vld [vmem:[%s5477_s3 + $0x8] ss:$16 sps:$4 sm:$0xff]   ;;  %v3680_v53 = vld [vmem:[%s5477_s3 + $0x1ec] ss:$16 sps:$4 sm:$0xff]   ;;  %vm3091_vm1 = vcmask 130048  }
  0x3a   :  { %829 = vmatprep.subr.bf16.mxu0 %v3653_v55  ;;  %v3678_v54 = vld [vmem:[%s5477_s3 + $0x1e8] ss:$16 sps:$4 sm:$0xff]   ;;  %v3686_v55 = vld [vmem:[%s5477_s3 + $0x1cc] ss:$16 sps:$4 sm:$0xff]  }
  0x3d   :  { %830 = vmatpush1.bf16.msra.mxu0 %v3651_v56  ;;  %v3684_v56 = vld [vmem:[%s5477_s3 + $0x1c8] ss:$16 sps:$4 sm:$0xff]  }
  0x3e   :  { %831 = vmatprep.subr.bf16.mxu0 %v3659_v57  ;;  %v3692_v57 = vld [vmem:[%s5477_s3 + $0x1ac] ss:$16 sps:$4 sm:$0xff]  }
  0x41   :  { %832 = vmatpush1.bf16.msra.mxu0 %v3657_v58  ;;  %v3690_v58 = vld [vmem:[%s5477_s3 + $0x1a8] ss:$16 sps:$4 sm:$0xff]  }
  0x42   :  { %833 = vmatprep.subr.bf16.mxu0 %v3665_v59  ;;  %v3698_v59 = vld [vmem:[%s5477_s3 + $0x18c] ss:$16 sps:$4 sm:$0xff]  }
  0x45   :  { %834 = vmatpush1.bf16.msra.mxu0 %v3663_v60  ;;  %v3696_v60 = vld [vmem:[%s5477_s3 + $0x188] ss:$16 sps:$4 sm:$0xff]  }
  0x46   :  { %835 = vmatprep.subr.bf16.mxu0 %v3671_v61  ;;  %v3704_v61 = vld [vmem:[%s5477_s3 + $0x16c] ss:$16 sps:$4 sm:$0xff]  }
  0x49   :  { %836 = vmatpush1.bf16.msra.mxu0 %v3669_v62  ;;  %v3702_v62 = vld [vmem:[%s5477_s3 + $0x168] ss:$16 sps:$4 sm:$0xff]  }
  0x4a   :  { %837 = vmatprep.subr.bf16.mxu0 %v3677_v63  ;;  %v3707_v63 = vld [vmem:[%s5477_s3 + $0x144] ss:$16 sps:$4 sm:$0xff]  }
  0x4d   :  { %838 = vmatpush2.bf16.msra.mxu0 %v3675_v0  ;;  %v3710_v0 = vld [vmem:[%s5477_s3 + $0x14c] ss:$16 sps:$4 sm:$0xff]  }
  0x4e   :  { %839 = vmatprep.subr.bf16.mxu0 %v3683_v1  ;;  %v3705_v1 = vld [vmem:[%s5477_s3 + $0x140] ss:$16 sps:$4 sm:$0xff]  }
  0x51   :  { %840 = vmatpush2.bf16.msra.mxu0 %v3681_v2  ;;  %v3708_v2 = vld [vmem:[%s5477_s3 + $0x148] ss:$16 sps:$4 sm:$0xff]  }
  0x52   :  { %841 = vmatprep.subr.bf16.mxu0 %v3689_v3  ;;  %v3713_v3 = vld [vmem:[%s5477_s3 + $0x124] ss:$16 sps:$4 sm:$0xff]  }
  0x55   :  { %842 = vmatpush2.bf16.msra.mxu0 %v3687_v4  ;;  %v3716_v4 = vld [vmem:[%s5477_s3 + $0x12c] ss:$16 sps:$4 sm:$0xff]  }
  0x56   :  { %843 = vmatprep.subr.bf16.mxu0 %v3695_v5  ;;  %v3711_v5 = vld [vmem:[%s5477_s3 + $0x120] ss:$16 sps:$4 sm:$0xff]  }
  0x59   :  { %844 = vmatpush2.bf16.msra.mxu0 %v3693_v6  ;;  %v3714_v6 = vld [vmem:[%s5477_s3 + $0x128] ss:$16 sps:$4 sm:$0xff]  }
  0x5a   :  { %845 = vmatprep.subr.bf16.mxu0 %v3701_v7  ;;  %v3719_v7 = vld [vmem:[%s5477_s3 + $0x104] ss:$16 sps:$4 sm:$0xff]  }
  0x5d   :  { %846 = vmatpush2.bf16.msra.mxu0 %v3699_v8  ;;  %v3722_v8 = vld [vmem:[%s5477_s3 + $0x10c] ss:$16 sps:$4 sm:$0xff]  }
  0x5e   :  { %847 = vmatprep.subr.bf16.mxu0 %v3707_v63  ;;  %v3743_v63 = vld [vmem:[%s5478_s4 + $0xe4] ss:$28 sps:$4 sm:$0xff]  }
  0x61   :  { %848 = vmatpush2.bf16.msra.mxu0 %v3705_v1 }
  0x62   :  { %849 = vmatprep.subr.bf16.mxu0 %v3713_v3 }
  0x65   :  { %850 = vmatpush2.bf16.msra.mxu0 %v3711_v5 }
  0x66   :  { %851 = vmatprep.subr.bf16.mxu0 %v3719_v7  ;;  %v3741_v7 = vld [vmem:[%s5478_s4 + $0xe0] ss:$28 sps:$4 sm:$0xff]  }
  0xe2   :  { %v3584_v9 = vpop.f32.mrf.mxu0 }
  0xe3   :  { %v174_v25 = vadd.f32 %v3584_v9, %v3158_v11  ;;  %v3717_v9 = vld [vmem:[%s5477_s3 + $0x100] ss:$16 sps:$4 sm:$0xff]  }
  0xe4   :  { %v165_v10 = vpop.f32.mrf.mxu0  ;;  %852 = vmatpush2.bf16.msra.mxu0 %v3717_v9 }
  0xe5   :  { %v166_v13 = vadd.f32 %v3158_v11, %v165_v10  ;;  %v198_v30 = vmax.f32 %v174_v25, 0.0  ;;  %v3720_v10 = vld [vmem:[%s5477_s3 + $0x108] ss:$16 sps:$4 sm:$0xff]  }
  0xe6   :  { %v3585_v12 = vpop.f32.mrf.mxu0 }
  0xe7   :  { %v196_v17 = vmax.f32 %v166_v13, 0.0  ;;  %v177_v21 = vadd.f32 %v3585_v12, %v3158_v11  ;;  %v3728_v12 = vld [vmem:[%s5478_s4 + $0x50c] ss:$28 sps:$4 sm:$0xff]   ;;  %v227_v13 = vlaneseq }
  0xe8   :  { %v168_v14 = vpop.f32.mrf.mxu0 }
  0xe9   :  { %v169_v15 = vadd.f32 %v3158_v11, %v168_v14  ;;  %v199_v28 = vmax.f32 %v177_v21, 0.0  ;;  %v4526_v14 = vshrl.u32 %v227_v13, 7 }
  0xea   :  { %v3588_v16 = vpop.f32.mrf.mxu0 }
  0xeb   :  { %v197_v18 = vmax.f32 %v169_v15, 0.0  ;;  %v205_v34 = vpack.c.bf16 %v199_v28, %v198_v30  ;;  %v190_v40 = vadd.f32 %v3588_v16, %v3158_v11  ;;  %v4529_v15 = vsub.s32 1, %v4526_v14 }
  0xec   :  { %v181_v19 = vpop.f32.mrf.mxu0  ;;  %v4532_v16 = vsub.s32 0, %v4526_v14 }
  0xed   :  { %v204_v22 = vpack.c.bf16 %v197_v18, %v196_v17  ;;  %v182_v31 = vadd.f32 %v3158_v11, %v181_v19  ;;  %v202_v46 = vmax.f32 %v190_v40, 0.0  ;;  %v3167_v17 = vld [vmem:[%s5479_s5 + $0x1] ss:$4 sm:$0x3]  ;;  %v3734_v40 = vld [vmem:[%s5478_s4 + $0x4d4] ss:$28 sps:$4 sm:$0xff]  }
  0xee   :  { %v3589_v24 = vpop.f32.mrf.mxu0  ;;  %v4538_v19 = vrot.slane %v3167_v17, %v4529_v15 }
  0xef   :  { %350 = vmatmul.mubr.bf16.vlgmr.msra.gmra.mxu1 %v204_v22  ;;  %v200_v36 = vmax.f32 %v182_v31, 0.0  ;;  %v193_v41 = vadd.f32 %v3589_v24, %v3158_v11 }
  0xf0   :  { %359 = vmatprep.mubr.bf16.mxu1 %v4178_v45  ;;  %v184_v26 = vpop.f32.mrf.mxu0  ;;  %895 = vmatpush1.bf16.msra.mxu1 %v3630_v20  ;;  %v4541_v20 = vrot.slane %v3167_v17, %v4532_v16 }
  0xf1   :  { %896 = vmatprep.subr.bf16.mxu1 %v3638_v23  ;;  %v185_v32 = vadd.f32 %v3158_v11, %v184_v26  ;;  %v203_v47 = vmax.f32 %v193_v41, 0.0  ;;  %v3725_v11 = vld [vmem:[%s5478_s4 + $0x18c] ss:$28 sps:$4 sm:$0xff]  }
  0xf2   :  { %2461 = vmatprep.subr.bf16.mxu0 %v3725_v11  ;;  %v3752_v11 = vld [vmem:[%s5478_s4 + $0x42c] ss:$28 sps:$4 sm:$0xff]  }
  0xf3   :  { %v201_v37 = vmax.f32 %v185_v32, 0.0  ;;  %v207_v50 = vpack.c.bf16 %v203_v47, %v202_v46  ;;  %v3729_v47 = vld [vmem:[%s5478_s4 + $0x150] ss:$28 sps:$4 sm:$0xff]  }
  0xf4   :  { %897 = vmatpush1.bf16.msra.mxu1 %v3636_v27 }
  0xf5   :  { %898 = vmatprep.subr.bf16.mxu1 %v3644_v29  ;;  %v206_v42 = vpack.c.bf16 %v201_v37, %v200_v36  ;;  %v3726_v36 = vld [vmem:[%s5478_s4 + $0x508] ss:$28 sps:$4 sm:$0xff]  }
  0xf7   :  { %360 = vmatmul.mubr.bf16.gmra.mxu1 %v205_v34 }
  0xf8   :  { %369 = vmatprep.mubr.bf16.mxu1 %v4178_v45  ;;  %899 = vmatpush1.bf16.msra.mxu1 %v3642_v33 }
  0xf9   :  { %900 = vmatprep.subr.bf16.mxu1 %v3650_v35  ;;  %v3723_v35 = vld [vmem:[%s5478_s4 + $0x188] ss:$28 sps:$4 sm:$0xff]  }
  0xfc   :  { %901 = vmatpush1.bf16.msra.mxu1 %v3648_v38 }
  0xfd   :  { %902 = vmatprep.subr.bf16.mxu1 %v3656_v39  ;;  %v3731_v39 = vld [vmem:[%s5478_s4 + $0x154] ss:$28 sps:$4 sm:$0xff]  }
  0xff   :  { %370 = vmatmul.mubr.bf16.gmra.mxu1 %v206_v42 }
 0x100   :  { %379 = vmatprep.mubr.bf16.mxu1 %v4178_v45  ;;  %903 = vmatpush1.bf16.msra.mxu1 %v3654_v43  ;;  %v3674_v45 = vld [vmem:[%s5477_s3 + $0xc] ss:$16 sps:$4 sm:$0xff]  }
 0x101   :  { %904 = vmatprep.subr.bf16.mxu1 %v3662_v44 }
 0x104   :  { %905 = vmatpush1.bf16.msra.mxu1 %v3660_v48  ;;  %v3732_v48 = vld [vmem:[%s5478_s4 + $0x4d0] ss:$28 sps:$4 sm:$0xff]  }
 0x105   :  { %906 = vmatprep.subr.bf16.mxu1 %v3668_v49 }
 0x107   :  { %380 = vmatmul.mubr.bf16.gmra.mxu1 %v207_v50 }
 0x108   :  { %907 = vmatpush1.bf16.msra.mxu1 %v3666_v51  ;;  %v3737_v51 = vld [vmem:[%s5478_s4 + $0x11c] ss:$28 sps:$4 sm:$0xff]  }
 0x109   :  { %908 = vmatprep.subr.bf16.mxu1 %v3674_v45  ;;  %v3740_v45 = vld [vmem:[%s5478_s4 + $0x49c] ss:$28 sps:$4 sm:$0xff]  }
 0x10c   :  { %909 = vmatpush1.bf16.msra.mxu1 %v3672_v52 }
 0x10d   :  { %910 = vmatprep.subr.bf16.mxu1 %v3680_v53 }
 0x110   :  { %911 = vmatpush2.bf16.msra.mxu1 %v3678_v54 }
 0x111   :  { %912 = vmatprep.subr.bf16.mxu1 %v3686_v55 }
 0x114   :  { %913 = vmatpush2.bf16.msra.mxu1 %v3684_v56 }
 0x115   :  { %914 = vmatprep.subr.bf16.mxu1 %v3692_v57 }
 0x118   :  { %915 = vmatpush2.bf16.msra.mxu1 %v3690_v58 }
 0x119   :  { %916 = vmatprep.subr.bf16.mxu1 %v3698_v59  ;;  %v3735_v59 = vld [vmem:[%s5478_s4 + $0x118] ss:$28 sps:$4 sm:$0xff]  }
 0x11c   :  { %917 = vmatpush2.bf16.msra.mxu1 %v3696_v60  ;;  %v3738_v60 = vld [vmem:[%s5478_s4 + $0x498] ss:$28 sps:$4 sm:$0xff]  }
 0x11d   :  { %918 = vmatprep.subr.bf16.mxu1 %v3704_v61 }
 0x120   :  { %919 = vmatpush2.bf16.msra.mxu1 %v3702_v62 }
 0x121   :  { %920 = vmatprep.subr.bf16.mxu1 %v3710_v0  ;;  %v3746_v0 = vld [vmem:[%s5478_s4 + $0x464] ss:$28 sps:$4 sm:$0xff]  }
 0x124   :  { %921 = vmatpush2.bf16.msra.mxu1 %v3708_v2 }
 0x125   :  { %922 = vmatprep.subr.bf16.mxu1 %v3716_v4 }
 0x128   :  { %923 = vmatpush2.bf16.msra.mxu1 %v3714_v6 }
 0x129   :  { %924 = vmatprep.subr.bf16.mxu1 %v3722_v8  ;;  %v3744_v8 = vld [vmem:[%s5478_s4 + $0x460] ss:$28 sps:$4 sm:$0xff]  }
 0x12c   :  { %925 = vmatpush2.bf16.msra.mxu1 %v3720_v10  ;;  %v3749_v10 = vld [vmem:[%s5478_s4 + $0xac] ss:$28 sps:$4 sm:$0xff]  }
 0x12d   :  { %2534 = vmatprep.subr.bf16.mxu1 %v3728_v12 }
 0x1af   :  { %v351_v18 = vpop.f32.mrf.mxu1 }
 0x1b0   :  { %v352_v25 = vadd.f32 %v351_v18, %v4541_v20 }
 0x1b1   :  { %v353_v21 = vpop.f32.mrf.mxu1 }
 0x1b2   :  { %v354_v23 = vadd.f32 %v353_v21, %v4538_v19  ;;  %v390_v32 = vmax.f32 %v352_v25, 0.0 }
 0x1b3   :  { %v355_v22 = vpop.f32.mrf.mxu1 }
 0x1b4   :  { %v356_v24 = vadd.f32 %v355_v22, %v4541_v20  ;;  %v391_v30 = vmax.f32 %v354_v23, 0.0  ;;  %v3747_v23 = vld [vmem:[%s5478_s4 + $0xa8] ss:$28 sps:$4 sm:$0xff]  }
 0x1b5   :  { %v357_v26 = vpop.f32.mrf.mxu1 }
 0x1b6   :  { %v358_v27 = vadd.f32 %v357_v26, %v4538_v19  ;;  %v392_v28 = vmax.f32 %v356_v24, 0.0  ;;  %v3750_v24 = vld [vmem:[%s5478_s4 + $0x428] ss:$28 sps:$4 sm:$0xff]   ;;  %v3755_v26 = vld [vmem:[%s5478_s4 + $0x74] ss:$28 sps:$4 sm:$0xff]  }
 0x1b7   :  { %v361_v29 = vpop.f32.mrf.mxu1 }
 0x1b8   :  { %v393_v31 = vmax.f32 %v358_v27, 0.0  ;;  %v406_v37 = vpack.c.bf16 %v392_v28, %v390_v32  ;;  %v362_v43 = vadd.f32 %v361_v29, %v4541_v20  ;;  %v3758_v27 = vld [vmem:[%s5478_s4 + $0x3f4] ss:$28 sps:$4 sm:$0xff]  }
 0x1b9   :  { %v363_v33 = vpop.f32.mrf.mxu1 }
 0x1ba   :  { %v407_v34 = vpack.c.bf16 %v393_v31, %v391_v30  ;;  %v364_v41 = vadd.f32 %v363_v33, %v4538_v19  ;;  %v394_v54 = vmax.f32 %v362_v43, 0.0  ;;  %v3765_v43 = vld [vmem:[%s5478_s4] ss:$28 sps:$4 sm:$0xff]  }
 0x1bb   :  { %v365_v38 = vpop.f32.mrf.mxu1 }
 0x1bc   :  { %v366_v42 = vadd.f32 %v365_v38, %v4541_v20  ;;  %853 = vmatprep.mubr.bf16.mxu0 %v407_v34  ;;  %926 = vmatprep.mubr.bf16.mxu1 %v407_v34  ;;  %v395_v52 = vmax.f32 %v364_v41, 0.0  ;;  %v3753_v34 = vld [vmem:[%s5478_s4 + $0x70] ss:$28 sps:$4 sm:$0xff]   ;;  %v3767_v41 = vld [vmem:[%s5478_s4 + $0x4] ss:$28 sps:$4 sm:$0xff]  }
 0x1bd   :  { %v367_v44 = vpop.f32.mrf.mxu1  ;;  %854 = vmatmul.mubr.bf16.vlgmr.msra.gmra.mxu0 %v406_v37  ;;  %927 = vmatmul.mubr.bf16.vlgmr.msra.gmra.mxu1 %v406_v37 }
 0x1be   :  { %v368_v46 = vadd.f32 %v367_v44, %v4538_v19  ;;  %2462 = vmatpush1.bf16.msra.mxu0 %v3723_v35  ;;  %2535 = vmatpush1.bf16.msra.mxu1 %v3726_v36  ;;  %v396_v49 = vmax.f32 %v366_v42, 0.0  ;;  %v3761_v35 = vld [vmem:[%s5478_s4 + $0x3c] ss:$28 sps:$4 sm:$0xff]   ;;  %v3770_v42 = vld [vmem:[%s5478_s4 + $0x384] ss:$28 sps:$4 sm:$0xff]  }
 0x1bf   :  { %v371_v50 = vpop.f32.mrf.mxu1  ;;  %2463 = vmatprep.subr.bf16.mxu0 %v3731_v39  ;;  %2536 = vmatprep.subr.bf16.mxu1 %v3734_v40  ;;  %v3759_v39 = vld [vmem:[%s5478_s4 + $0x38] ss:$28 sps:$4 sm:$0xff]   ;;  %v3768_v44 = vld [vmem:[%s5478_s4 + $0x380] ss:$28 sps:$4 sm:$0xff]  }
 0x1c0   :  { %v397_v53 = vmax.f32 %v368_v46, 0.0  ;;  %v372_v55 = vadd.f32 %v371_v50, %v4541_v20  ;;  %v408_v61 = vpack.c.bf16 %v396_v49, %v394_v54  ;;  %v3762_v40 = vld [vmem:[%s5478_s4 + $0x3b8] ss:$28 sps:$4 sm:$0xff]   ;;  %v3773_v46 = vld [vmem:[%s5478_s4 + $0x34c] ss:$28 sps:$4 sm:$0xff]  }
 0x1c1   :  { %v373_v56 = vpop.f32.mrf.mxu1  ;;  %v3774_v49 = vld [vmem:[%s5478_s4 + $0x6c8] ss:$28 sps:$4 sm:$0xff]   ;;  %v3779_v50 = vld [vmem:[%s5478_s4 + $0x314] ss:$28 sps:$4 sm:$0xff]   ;;  %v3788_v54 = vld [vmem:[%s5478_s4 + $0x65c] ss:$28 sps:$4 sm:$0xff]  }
 0x1c2   :  { %v409_v57 = vpack.c.bf16 %v397_v53, %v395_v52  ;;  %v374_v58 = vadd.f32 %v373_v56, %v4538_v19  ;;  %2464 = vmatpush1.bf16.msra.mxu0 %v3729_v47  ;;  %2537 = vmatpush1.bf16.msra.mxu1 %v3732_v48  ;;  %v398_v2 = vmax.f32 %v372_v55, 0.0  ;;  %v3776_v47 = vld [vmem:[%s5478_s4 + $0x6cc] ss:$28 sps:$4 sm:$0xff]   ;;  %v3785_v53 = vld [vmem:[%s5478_s4 + $0x2dc] ss:$28 sps:$4 sm:$0xff]  }
 0x1c3   :  { %v375_v62 = vpop.f32.mrf.mxu1  ;;  %2465 = vmatprep.subr.bf16.mxu0 %v3737_v51  ;;  %2538 = vmatprep.subr.bf16.mxu1 %v3740_v45  ;;  %v3771_v48 = vld [vmem:[%s5478_s4 + $0x348] ss:$28 sps:$4 sm:$0xff]   ;;  %v3782_v51 = vld [vmem:[%s5478_s4 + $0x694] ss:$28 sps:$4 sm:$0xff]  }
 0x1c4   :  { %v376_v1 = vadd.f32 %v375_v62, %v4541_v20  ;;  %863 = vmatprep.mubr.bf16.mxu0 %v409_v57  ;;  %936 = vmatprep.mubr.bf16.mxu1 %v409_v57  ;;  %v399_v4 = vmax.f32 %v374_v58, 0.0  ;;  %v3777_v45 = vld [vmem:[%s5478_s4 + $0x310] ss:$28 sps:$4 sm:$0xff]   ;;  %v3783_v55 = vld [vmem:[%s5478_s4 + $0x2d8] ss:$28 sps:$4 sm:$0xff]  }
 0x1c5   :  { %v377_v3 = vpop.f32.mrf.mxu1  ;;  %864 = vmatmul.mubr.bf16.gmra.mxu0 %v408_v61  ;;  %937 = vmatmul.mubr.bf16.gmra.mxu1 %v408_v61  ;;  %v3780_v52 = vld [vmem:[%s5478_s4 + $0x690] ss:$28 sps:$4 sm:$0xff]   ;;  %v3786_v56 = vld [vmem:[%s5478_s4 + $0x658] ss:$28 sps:$4 sm:$0xff]   ;;  %v3791_v57 = vld [vmem:[%s5478_s4 + $0x2a4] ss:$28 sps:$4 sm:$0xff]  }
 0x1c6   :  { %v400_v5 = vmax.f32 %v376_v1, 0.0  ;;  %v378_v6 = vadd.f32 %v377_v3, %v4538_v19  ;;  %2466 = vmatpush1.bf16.msra.mxu0 %v3735_v59  ;;  %2539 = vmatpush1.bf16.msra.mxu1 %v3738_v60  ;;  %v3794_v58 = vld [vmem:[%s5478_s4 + $0x624] ss:$28 sps:$4 sm:$0xff]   ;;  %v3797_v61 = vld [vmem:[%s5478_s4 + $0x26c] ss:$28 sps:$4 sm:$0xff]  }
 0x1c7   :  { %v381_v9 = vpop.f32.mrf.mxu1  ;;  %2467 = vmatprep.subr.bf16.mxu0 %v3743_v63  ;;  %2540 = vmatprep.subr.bf16.mxu1 %v3746_v0  ;;  %v3789_v59 = vld [vmem:[%s5478_s4 + $0x2a0] ss:$28 sps:$4 sm:$0xff]   ;;  %v3800_v62 = vld [vmem:[%s5478_s4 + $0x5ec] ss:$28 sps:$4 sm:$0xff]   ;;  %v3803_v1 = vld [vmem:[%s5478_s4 + $0x234] ss:$28 sps:$4 sm:$0xff]  }
 0x1c8   :  { %v401_v12 = vmax.f32 %v378_v6, 0.0  ;;  %v410_v13 = vpack.c.bf16 %v400_v5, %v398_v2  ;;  %v382_v17 = vadd.f32 %v381_v9, %v4541_v20  ;;  %v3792_v60 = vld [vmem:[%s5478_s4 + $0x620] ss:$28 sps:$4 sm:$0xff]   ;;  %v3795_v63 = vld [vmem:[%s5478_s4 + $0x268] ss:$28 sps:$4 sm:$0xff]  }
 0x1c9   :  { %v383_v18 = vpop.f32.mrf.mxu1  ;;  %v3798_v0 = vld [vmem:[%s5478_s4 + $0x5e8] ss:$28 sps:$4 sm:$0xff]   ;;  %v3806_v2 = vld [vmem:[%s5478_s4 + $0x5b4] ss:$28 sps:$4 sm:$0xff]   ;;  %v3809_v5 = vld [vmem:[%s5478_s4 + $0x1fc] ss:$28 sps:$4 sm:$0xff]  }
 0x1ca   :  { %v411_v21 = vpack.c.bf16 %v401_v12, %v399_v4  ;;  %v384_v22 = vadd.f32 %v383_v18, %v4538_v19  ;;  %2468 = vmatpush1.bf16.msra.mxu0 %v3741_v7  ;;  %2541 = vmatpush1.bf16.msra.mxu1 %v3744_v8  ;;  %v402_v29 = vmax.f32 %v382_v17, 0.0  ;;  %v3801_v3 = vld [vmem:[%s5478_s4 + $0x230] ss:$28 sps:$4 sm:$0xff]   ;;  %v3812_v6 = vld [vmem:[%s5478_s4 + $0x57c] ss:$28 sps:$4 sm:$0xff]   ;;  %v495_v18 = vsub.s32 3, %v4526_v14 }
 0x1cb   :  { %v385_v25 = vpop.f32.mrf.mxu1  ;;  %2469 = vmatprep.subr.bf16.mxu0 %v3749_v10  ;;  %2542 = vmatprep.subr.bf16.mxu1 %v3752_v11  ;;  %v3804_v4 = vld [vmem:[%s5478_s4 + $0x5b0] ss:$28 sps:$4 sm:$0xff]   ;;  %v3807_v7 = vld [vmem:[%s5478_s4 + $0x1f8] ss:$28 sps:$4 sm:$0xff]   ;;  %v3815_v9 = vld [vmem:[%s5478_s4 + $0x1c4] ss:$28 sps:$4 sm:$0xff]  }
 0x1cc   :  { %v386_v28 = vadd.f32 %v385_v25, %v4541_v20  ;;  %873 = vmatprep.mubr.bf16.mxu0 %v411_v21  ;;  %946 = vmatprep.mubr.bf16.mxu1 %v411_v21  ;;  %v403_v31 = vmax.f32 %v384_v22, 0.0  ;;  %v3756_v20 = vld [vmem:[%s5478_s4 + $0x3f0] ss:$28 sps:$4 sm:$0xff]   ;;  %v3810_v8 = vld [vmem:[%s5478_s4 + $0x578] ss:$28 sps:$4 sm:$0xff]   ;;  %v491_v21 = vsub.s32 2, %v4526_v14 }
 0x1cd   :  { %v387_v30 = vpop.f32.mrf.mxu1  ;;  %874 = vmatmul.mubr.bf16.gmra.mxu0 %v410_v13  ;;  %947 = vmatmul.mubr.bf16.gmra.mxu1 %v410_v13  ;;  %v3818_v10 = vld [vmem:[%s5478_s4 + $0x544] ss:$28 sps:$4 sm:$0xff]   ;;  %v3821_v13 = vld [vmem:[%s5478_s4 + $0x194] ss:$28 sps:$4 sm:$0xff]  }
 0x1ce   :  { %v404_v32 = vmax.f32 %v386_v28, 0.0  ;;  %v388_v33 = vadd.f32 %v387_v30, %v4538_v19  ;;  %2470 = vmatpush1.bf16.msra.mxu0 %v3747_v23  ;;  %2543 = vmatpush1.bf16.msra.mxu1 %v3750_v24  ;;  %v3764_v19 = vld [vmem:[%s5478_s4 + $0x3bc] ss:$28 sps:$4 sm:$0xff]   ;;  %v3824_v17 = vld [vmem:[%s5478_s4 + $0x514] ss:$28 sps:$4 sm:$0xff]  }
 0x1cf   :  { %2471 = vmatprep.subr.bf16.mxu0 %v3755_v26  ;;  %2544 = vmatprep.subr.bf16.mxu1 %v3758_v27  ;;  %v3813_v11 = vld [vmem:[%s5478_s4 + $0x1c0] ss:$28 sps:$4 sm:$0xff]  }
 0x1d0   :  { %v405_v36 = vmax.f32 %v388_v33, 0.0  ;;  %v412_v37 = vpack.c.bf16 %v404_v32, %v402_v29  ;;  %v3816_v12 = vld [vmem:[%s5478_s4 + $0x540] ss:$28 sps:$4 sm:$0xff]  }
 0x1d1   :  { %v3184_v22 = vld [vmem:[%s5479_s5 + $0x2] ss:$4 sm:$0xf] }
 0x1d2   :  { %v413_v38 = vpack.c.bf16 %v405_v36, %v403_v31  ;;  %2472 = vmatpush1.bf16.msra.mxu0 %v3753_v34  ;;  %2545 = vmatpush1.bf16.msra.mxu1 %v3756_v20  ;;  %v4757_v25 = vrot.slane %v3184_v22, %v4529_v15  ;;  %v4761_v26 = vrot.slane %v3184_v22, %v495_v18 }
 0x1d3   :  { %2473 = vmatprep.subr.bf16.mxu0 %v3761_v35  ;;  %2546 = vmatprep.subr.bf16.mxu1 %v3764_v19  ;;  %v4764_v27 = vrot.slane %v3184_v22, %v4532_v16  ;;  %v4768_v28 = vrot.slane %v3184_v22, %v491_v21  ;;  %v3833_v22 = vld [vmem:[%s5478_s4 + $0x124] ss:$28 sps:$4 sm:$0xff]  }
 0x1d4   :  { %883 = vmatprep.mubr.bf16.mxu0 %v413_v38  ;;  %956 = vmatprep.mubr.bf16.mxu1 %v413_v38 }
 0x1d5   :  { %884 = vmatmul.mubr.bf16.gmra.mxu0 %v412_v37  ;;  %957 = vmatmul.mubr.bf16.gmra.mxu1 %v412_v37 }
 0x1d6   :  { %2474 = vmatpush1.bf16.msra.mxu0 %v3759_v39  ;;  %2547 = vmatpush1.bf16.msra.mxu1 %v3762_v40 }
 0x1d7   :  { %2475 = vmatprep.subr.bf16.mxu0 %v3767_v41  ;;  %2548 = vmatprep.subr.bf16.mxu1 %v3770_v42 }
 0x1da   :  { %2476 = vmatpush1.bf16.msra.mxu0 %v3765_v43  ;;  %2549 = vmatpush1.bf16.msra.mxu1 %v3768_v44 }
 0x1db   :  { %2477 = vmatprep.subr.bf16.mxu0 %v3773_v46  ;;  %2550 = vmatprep.subr.bf16.mxu1 %v3776_v47 }
 0x1de   :  { %2478 = vmatpush2.bf16.msra.mxu0 %v3771_v48  ;;  %2551 = vmatpush2.bf16.msra.mxu1 %v3774_v49 }
 0x1df   :  { %2479 = vmatprep.subr.bf16.mxu0 %v3779_v50  ;;  %2552 = vmatprep.subr.bf16.mxu1 %v3782_v51 }
 0x1e2   :  { %2480 = vmatpush2.bf16.msra.mxu0 %v3777_v45  ;;  %2553 = vmatpush2.bf16.msra.mxu1 %v3780_v52 }
 0x1e3   :  { %2481 = vmatprep.subr.bf16.mxu0 %v3785_v53  ;;  %2554 = vmatprep.subr.bf16.mxu1 %v3788_v54 }
 0x1e6   :  { %2482 = vmatpush2.bf16.msra.mxu0 %v3783_v55  ;;  %2555 = vmatpush2.bf16.msra.mxu1 %v3786_v56  ;;  %v3819_v55 = vld [vmem:[%s5478_s4 + $0x190] ss:$28 sps:$4 sm:$0xff]  }
 0x1e7   :  { %2483 = vmatprep.subr.bf16.mxu0 %v3791_v57  ;;  %2556 = vmatprep.subr.bf16.mxu1 %v3794_v58  ;;  %v3822_v56 = vld [vmem:[%s5478_s4 + $0x510] ss:$28 sps:$4 sm:$0xff]  }
 0x1ea   :  { %2484 = vmatpush2.bf16.msra.mxu0 %v3789_v59  ;;  %2557 = vmatpush2.bf16.msra.mxu1 %v3792_v60 }
 0x1eb   :  { %2485 = vmatprep.subr.bf16.mxu0 %v3797_v61  ;;  %2558 = vmatprep.subr.bf16.mxu1 %v3800_v62  ;;  %v3827_v62 = vld [vmem:[%s5478_s4 + $0x15c] ss:$28 sps:$4 sm:$0xff]  }
 0x1ee   :  { %2486 = vmatpush2.bf16.msra.mxu0 %v3795_v63  ;;  %2559 = vmatpush2.bf16.msra.mxu1 %v3798_v0  ;;  %v3830_v63 = vld [vmem:[%s5478_s4 + $0x4dc] ss:$28 sps:$4 sm:$0xff]  }
 0x1ef   :  { %2487 = vmatprep.subr.bf16.mxu0 %v3803_v1  ;;  %2560 = vmatprep.subr.bf16.mxu1 %v3806_v2 }
 0x1f2   :  { %2488 = vmatpush2.bf16.msra.mxu0 %v3801_v3  ;;  %2561 = vmatpush2.bf16.msra.mxu1 %v3804_v4 }
 0x1f3   :  { %2489 = vmatprep.subr.bf16.mxu0 %v3809_v5  ;;  %2562 = vmatprep.subr.bf16.mxu1 %v3812_v6 }
 0x1f6   :  { %2490 = vmatpush2.bf16.msra.mxu0 %v3807_v7  ;;  %2563 = vmatpush2.bf16.msra.mxu1 %v3810_v8 }
 0x1f7   :  { %2491 = vmatprep.subr.bf16.mxu0 %v3815_v9  ;;  %2564 = vmatprep.subr.bf16.mxu1 %v3818_v10  ;;  %v3825_v9 = vld [vmem:[%s5478_s4 + $0x158] ss:$28 sps:$4 sm:$0xff]  }
 0x1fa   :  { %2492 = vmatpush2.bf16.msra.mxu0 %v3813_v11  ;;  %2565 = vmatpush2.bf16.msra.mxu1 %v3816_v12 }
 0x1fb   :  { %2607 = vmatprep.subr.bf16.mxu0 %v3821_v13  ;;  %2680 = vmatprep.subr.bf16.mxu1 %v3824_v17  ;;  %v3828_v17 = vld [vmem:[%s5478_s4 + $0x4d8] ss:$28 sps:$4 sm:$0xff]  }
 0x27d   :  { %v855_v23 = vpop.f32.mrf.mxu0  ;;  %v928_v24 = vpop.f32.mrf.mxu1 }
 0x27e   :  { %v856_v19 = vadd.f32 %v855_v23, %v4764_v27  ;;  %v929_v36 = vadd.f32 %v928_v24, %v4768_v28 }
 0x27f   :  { %v857_v29 = vpop.f32.mrf.mxu0  ;;  %v930_v30 = vpop.f32.mrf.mxu1 }
 0x280   :  { %v858_v33 = vadd.f32 %v857_v29, %v4757_v25  ;;  %v931_v34 = vadd.f32 %v930_v30, %v4761_v26  ;;  %v967_v50 = vmax.f32 %v856_v19, 0.0  ;;  %v969_v51 = vmax.f32 %v929_v36, 0.0  ;;  %v3836_v19 = vld [vmem:[%s5478_s4 + $0x4a4] ss:$28 sps:$4 sm:$0xff]  }
 0x281   :  { %v859_v31 = vpop.f32.mrf.mxu0  ;;  %v932_v32 = vpop.f32.mrf.mxu1 }
 0x282   :  { %v860_v20 = vadd.f32 %v859_v31, %v4764_v27  ;;  %v933_v35 = vadd.f32 %v932_v32, %v4768_v28  ;;  %v968_v46 = vmax.f32 %v858_v33, 0.0  ;;  %v970_v47 = vmax.f32 %v931_v34, 0.0 }
 0x283   :  { %v861_v37 = vpop.f32.mrf.mxu0  ;;  %v934_v38 = vpop.f32.mrf.mxu1 }
 0x284   :  { %v862_v39 = vadd.f32 %v861_v37, %v4757_v25  ;;  %v935_v40 = vadd.f32 %v934_v38, %v4761_v26  ;;  %v971_v41 = vmax.f32 %v860_v20, 0.0  ;;  %v973_v42 = vmax.f32 %v933_v35, 0.0 }
 0x285   :  { %v865_v43 = vpop.f32.mrf.mxu0  ;;  %v938_v44 = vpop.f32.mrf.mxu1 }
 0x286   :  { %v972_v48 = vmax.f32 %v862_v39, 0.0  ;;  %v974_v49 = vmax.f32 %v935_v40, 0.0  ;;  %v4788_v57 = vpack.c.bf16 %v971_v41, %v967_v50  ;;  %v4790_v58 = vpack.c.bf16 %v973_v42, %v969_v51  ;;  %v3831_v40 = vld [vmem:[%s5478_s4 + $0x120] ss:$28 sps:$4 sm:$0xff]   ;;  %v3842_v50 = vld [vmem:[%s5478_s4 + $0x46c] ss:$28 sps:$4 sm:$0xff]  }
 0x287   :  { %v867_v45 = vpop.f32.mrf.mxu0  ;;  %v940_v52 = vpop.f32.mrf.mxu1  ;;  %v866_v3 = vadd.f32 %v865_v43, %v4764_v27  ;;  %v939_v4 = vadd.f32 %v938_v44, %v4768_v28  ;;  %v3834_v44 = vld [vmem:[%s5478_s4 + $0x4a0] ss:$28 sps:$4 sm:$0xff]  }
 0x288   :  { %v4778_v53 = vpack.c.bf16 %v972_v48, %v968_v46  ;;  %v4780_v54 = vpack.c.bf16 %v974_v49, %v970_v47  ;;  %v868_v59 = vadd.f32 %v867_v45, %v4757_v25  ;;  %v941_v0 = vadd.f32 %v940_v52, %v4761_v26  ;;  %v3839_v46 = vld [vmem:[%s5478_s4 + $0xec] ss:$28 sps:$4 sm:$0xff]  }
 0x289   :  { %v869_v60 = vpop.f32.mrf.mxu0  ;;  %v942_v61 = vpop.f32.mrf.mxu1  ;;  %v975_v31 = vmax.f32 %v866_v3, 0.0  ;;  %v977_v32 = vmax.f32 %v939_v4, 0.0  ;;  %v3840_v3 = vld [vmem:[%s5478_s4 + $0x468] ss:$28 sps:$4 sm:$0xff]   ;;  %v3845_v4 = vld [vmem:[%s5478_s4 + $0xb4] ss:$28 sps:$4 sm:$0xff]  }
 0x28a   :  { %v870_v1 = vadd.f32 %v869_v60, %v4764_v27  ;;  %v943_v2 = vadd.f32 %v942_v61, %v4768_v28  ;;  %2493 = vmatprep.mubr.bf16.mxu0 %v4778_v53  ;;  %2566 = vmatprep.mubr.bf16.mxu1 %v4780_v54  ;;  %v976_v10 = vmax.f32 %v868_v59, 0.0  ;;  %v978_v23 = vmax.f32 %v941_v0, 0.0  ;;  %v3837_v0 = vld [vmem:[%s5478_s4 + $0xe8] ss:$28 sps:$4 sm:$0xff]  }
 0x28b   :  { %v871_v5 = vpop.f32.mrf.mxu0  ;;  %v944_v6 = vpop.f32.mrf.mxu1  ;;  %2494 = vmatmul.mubr.bf16.vlgmr.msra.gmra.mxu0 %v4788_v57  ;;  %2567 = vmatmul.mubr.bf16.vlgmr.msra.gmra.mxu1 %v4790_v58 }
 0x28c   :  { %v872_v7 = vadd.f32 %v871_v5, %v4757_v25  ;;  %v945_v8 = vadd.f32 %v944_v6, %v4761_v26  ;;  %2608 = vmatpush1.bf16.msra.mxu0 %v3819_v55  ;;  %2681 = vmatpush1.bf16.msra.mxu1 %v3822_v56  ;;  %v979_v11 = vmax.f32 %v870_v1, 0.0  ;;  %v981_v24 = vmax.f32 %v943_v2, 0.0 }
 0x28d   :  { %v875_v12 = vpop.f32.mrf.mxu0  ;;  %v948_v13 = vpop.f32.mrf.mxu1  ;;  %2609 = vmatprep.subr.bf16.mxu0 %v3827_v62  ;;  %2682 = vmatprep.subr.bf16.mxu1 %v3830_v63 }
 0x28e   :  { %v980_v29 = vmax.f32 %v872_v7, 0.0  ;;  %v982_v30 = vmax.f32 %v945_v8, 0.0  ;;  %v876_v33 = vadd.f32 %v875_v12, %v4764_v27  ;;  %v949_v34 = vadd.f32 %v948_v13, %v4768_v28  ;;  %v3848_v13 = vld [vmem:[%s5478_s4 + $0x434] ss:$28 sps:$4 sm:$0xff]  }
 0x28f   :  { %v877_v20 = vpop.f32.mrf.mxu0  ;;  %v950_v35 = vpop.f32.mrf.mxu1  ;;  %v4833_v41 = vpack.c.bf16 %v979_v11, %v975_v31  ;;  %v4841_v47 = vpack.c.bf16 %v981_v24, %v977_v32  ;;  %v3846_v32 = vld [vmem:[%s5478_s4 + $0x430] ss:$28 sps:$4 sm:$0xff]  }
 0x290   :  { %v4824_v36 = vpack.c.bf16 %v980_v29, %v976_v10  ;;  %v4826_v37 = vpack.c.bf16 %v982_v30, %v978_v23  ;;  %v878_v38 = vadd.f32 %v877_v20, %v4757_v25  ;;  %v951_v39 = vadd.f32 %v950_v35, %v4761_v26  ;;  %2610 = vmatpush1.bf16.msra.mxu0 %v3825_v9  ;;  %v3843_v29 = vld [vmem:[%s5478_s4 + $0xb0] ss:$28 sps:$4 sm:$0xff]   ;;  %v3854_v35 = vld [vmem:[%s5478_s4 + $0x3fc] ss:$28 sps:$4 sm:$0xff]  }
 0x291   :  { %2683 = vmatpush1.bf16.msra.mxu1 %v3828_v17  ;;  %v879_v42 = vpop.f32.mrf.mxu0  ;;  %v952_v43 = vpop.f32.mrf.mxu1  ;;  %2611 = vmatprep.subr.bf16.mxu0 %v3833_v22  ;;  %v983_v51 = vmax.f32 %v876_v33, 0.0  ;;  %v985_v45 = vmax.f32 %v949_v34, 0.0  ;;  %v3851_v33 = vld [vmem:[%s5478_s4 + $0x7c] ss:$28 sps:$4 sm:$0xff]  }
 0x292   :  { %v880_v48 = vadd.f32 %v879_v42, %v4764_v27  ;;  %v953_v49 = vadd.f32 %v952_v43, %v4768_v28  ;;  %2503 = vmatprep.mubr.bf16.mxu0 %v4824_v36  ;;  %2576 = vmatprep.mubr.bf16.mxu1 %v4826_v37  ;;  %v984_v52 = vmax.f32 %v878_v38, 0.0  ;;  %v986_v55 = vmax.f32 %v951_v39, 0.0 }
 0x293   :  { %2684 = vmatprep.subr.bf16.mxu1 %v3836_v19  ;;  %v881_v56 = vpop.f32.mrf.mxu0  ;;  %v954_v59 = vpop.f32.mrf.mxu1  ;;  %2504 = vmatmul.mubr.bf16.gmra.mxu0 %v4833_v41 }
 0x294   :  { %v987_v60 = vmax.f32 %v880_v48, 0.0  ;;  %v989_v61 = vmax.f32 %v953_v49, 0.0  ;;  %v882_v62 = vadd.f32 %v881_v56, %v4757_v25  ;;  %v955_v63 = vadd.f32 %v954_v59, %v4761_v26  ;;  %2577 = vmatmul.mubr.bf16.gmra.mxu1 %v4841_v47  ;;  %2612 = vmatpush1.bf16.msra.mxu0 %v3831_v40  ;;  %v3849_v48 = vld [vmem:[%s5478_s4 + $0x78] ss:$28 sps:$4 sm:$0xff]   ;;  %v3855_v59 = vld [vmem:[%s5478_s4 + $0x40] ss:$28 sps:$4 sm:$0xff]  }
 0x295   :  { %2685 = vmatpush1.bf16.msra.mxu1 %v3834_v44  ;;  %v885_v1 = vpop.f32.mrf.mxu0  ;;  %v958_v2 = vpop.f32.mrf.mxu1  ;;  %2613 = vmatprep.subr.bf16.mxu0 %v3839_v46  ;;  %v3852_v49 = vld [vmem:[%s5478_s4 + $0x3f8] ss:$28 sps:$4 sm:$0xff]  }
 0x296   :  { %v988_v5 = vmax.f32 %v882_v62, 0.0  ;;  %v990_v6 = vmax.f32 %v955_v63, 0.0  ;;  %2686 = vmatprep.subr.bf16.mxu1 %v3842_v50  ;;  %v4863_v7 = vpack.c.bf16 %v987_v60, %v983_v51  ;;  %v4865_v8 = vpack.c.bf16 %v989_v61, %v985_v45  ;;  %v3857_v50 = vld [vmem:[%s5478_s4 + $0x44] ss:$28 sps:$4 sm:$0xff]   ;;  %v3863_v61 = vld [vmem:[%s5478_s4 + $0xc] ss:$28 sps:$4 sm:$0xff]  }
 0x297   :  { %v886_v9 = vadd.f32 %v885_v1, %v4764_v27  ;;  %v959_v10 = vadd.f32 %v958_v2, %v4768_v28  ;;  %v887_v11 = vpop.f32.mrf.mxu0  ;;  %v960_v12 = vpop.f32.mrf.mxu1  ;;  %v3860_v45 = vld [vmem:[%s5478_s4 + $0x3c4] ss:$28 sps:$4 sm:$0xff]   ;;  %v3866_v62 = vld [vmem:[%s5478_s4 + $0x38c] ss:$28 sps:$4 sm:$0xff]   ;;  %v3869_v1 = vld [vmem:[%s5478_s4 + $0x354] ss:$28 sps:$4 sm:$0xff]  }
 0x298   :  { %v4872_v17 = vpack.c.bf16 %v988_v5, %v984_v52  ;;  %v4874_v22 = vpack.c.bf16 %v990_v6, %v986_v55  ;;  %v888_v23 = vadd.f32 %v887_v11, %v4757_v25  ;;  %v961_v24 = vadd.f32 %v960_v12, %v4761_v26  ;;  %2614 = vmatpush1.bf16.msra.mxu0 %v3837_v0  ;;  %v3858_v60 = vld [vmem:[%s5478_s4 + $0x3c0] ss:$28 sps:$4 sm:$0xff]   ;;  %v3861_v63 = vld [vmem:[%s5478_s4 + $0x8] ss:$28 sps:$4 sm:$0xff]   ;;  %v3872_v2 = vld [vmem:[%s5478_s4 + $0x6d4] ss:$28 sps:$4 sm:$0xff]  }
 0x299   :  { %2687 = vmatpush1.bf16.msra.mxu1 %v3840_v3  ;;  %v889_v30 = vpop.f32.mrf.mxu0  ;;  %v962_v31 = vpop.f32.mrf.mxu1  ;;  %2615 = vmatprep.subr.bf16.mxu0 %v3845_v4  ;;  %v991_v19 = vmax.f32 %v886_v9, 0.0  ;;  %v993_v38 = vmax.f32 %v959_v10, 0.0  ;;  %v3864_v0 = vld [vmem:[%s5478_s4 + $0x388] ss:$28 sps:$4 sm:$0xff]   ;;  %v3867_v3 = vld [vmem:[%s5478_s4 + $0x350] ss:$28 sps:$4 sm:$0xff]  }
 0x29a   :  { %v890_v34 = vadd.f32 %v889_v30, %v4764_v27  ;;  %v963_v20 = vadd.f32 %v962_v31, %v4768_v28  ;;  %2513 = vmatprep.mubr.bf16.mxu0 %v4872_v17  ;;  %2586 = vmatprep.mubr.bf16.mxu1 %v4874_v22  ;;  %v992_v39 = vmax.f32 %v888_v23, 0.0  ;;  %v994_v40 = vmax.f32 %v961_v24, 0.0  ;;  %v3870_v4 = vld [vmem:[%s5478_s4 + $0x6d0] ss:$28 sps:$4 sm:$0xff]   ;;  %v3875_v5 = vld [vmem:[%s5478_s4 + $0x31c] ss:$28 sps:$4 sm:$0xff]  }
 0x29b   :  { %2688 = vmatprep.subr.bf16.mxu1 %v3848_v13  ;;  %v891_v42 = vpop.f32.mrf.mxu0  ;;  %v964_v43 = vpop.f32.mrf.mxu1  ;;  %2514 = vmatmul.mubr.bf16.gmra.mxu0 %v4863_v7  ;;  %v3878_v6 = vld [vmem:[%s5478_s4 + $0x69c] ss:$28 sps:$4 sm:$0xff]   ;;  %v3881_v11 = vld [vmem:[%s5478_s4 + $0x2e4] ss:$28 sps:$4 sm:$0xff]   ;;  %v3887_v24 = vld [vmem:[%s5478_s4 + $0x2ac] ss:$28 sps:$4 sm:$0xff]  }
 0x29c   :  { %v995_v27 = vmax.f32 %v890_v34, 0.0  ;;  %v997_v44 = vmax.f32 %v963_v20, 0.0  ;;  %v892_v28 = vadd.f32 %v891_v42, %v4757_v25  ;;  %v965_v46 = vadd.f32 %v964_v43, %v4761_v26  ;;  %2587 = vmatmul.mubr.bf16.gmra.mxu1 %v4865_v8  ;;  %2616 = vmatpush1.bf16.msra.mxu0 %v3843_v29  ;;  %v3873_v9 = vld [vmem:[%s5478_s4 + $0x318] ss:$28 sps:$4 sm:$0xff]   ;;  %v3884_v12 = vld [vmem:[%s5478_s4 + $0x664] ss:$28 sps:$4 sm:$0xff]  }
 0x29d   :  { %2689 = vmatpush1.bf16.msra.mxu1 %v3846_v32  ;;  %2617 = vmatprep.subr.bf16.mxu0 %v3851_v33  ;;  %v3876_v10 = vld [vmem:[%s5478_s4 + $0x698] ss:$28 sps:$4 sm:$0xff]   ;;  %v3879_v13 = vld [vmem:[%s5478_s4 + $0x2e0] ss:$28 sps:$4 sm:$0xff]   ;;  %v3890_v29 = vld [vmem:[%s5478_s4 + $0x62c] ss:$28 sps:$4 sm:$0xff]  }
 0x29e   :  { %v996_v25 = vmax.f32 %v892_v28, 0.0  ;;  %v998_v51 = vmax.f32 %v965_v46, 0.0  ;;  %2690 = vmatprep.subr.bf16.mxu1 %v3854_v35  ;;  %v4907_v26 = vpack.c.bf16 %v995_v27, %v991_v19  ;;  %v4912_v52 = vpack.c.bf16 %v997_v44, %v993_v38  ;;  %v3882_v23 = vld [vmem:[%s5478_s4 + $0x660] ss:$28 sps:$4 sm:$0xff]   ;;  %v3885_v30 = vld [vmem:[%s5478_s4 + $0x2a8] ss:$28 sps:$4 sm:$0xff]  }
 0x29f   :  { %v3888_v31 = vld [vmem:[%s5478_s4 + $0x628] ss:$28 sps:$4 sm:$0xff]   ;;  %v3893_v32 = vld [vmem:[%s5478_s4 + $0x274] ss:$28 sps:$4 sm:$0xff]   ;;  %v3899_v35 = vld [vmem:[%s5478_s4 + $0x23c] ss:$28 sps:$4 sm:$0xff]  }
 0x2a0   :  { %v4914_v55 = vpack.c.bf16 %v996_v25, %v992_v39  ;;  %v4916_v56 = vpack.c.bf16 %v998_v51, %v994_v40  ;;  %2618 = vmatpush1.bf16.msra.mxu0 %v3849_v48  ;;  %v3896_v33 = vld [vmem:[%s5478_s4 + $0x5f4] ss:$28 sps:$4 sm:$0xff]   ;;  %v3902_v19 = vld [vmem:[%s5478_s4 + $0x5bc] ss:$28 sps:$4 sm:$0xff]   ;;  %v3905_v40 = vld [vmem:[%s5478_s4 + $0x204] ss:$28 sps:$4 sm:$0xff]  }
 0x2a1   :  { %2691 = vmatpush1.bf16.msra.mxu1 %v3852_v49  ;;  %2619 = vmatprep.subr.bf16.mxu0 %v3857_v50  ;;  %v3891_v34 = vld [vmem:[%s5478_s4 + $0x270] ss:$28 sps:$4 sm:$0xff]   ;;  %v3897_v38 = vld [vmem:[%s5478_s4 + $0x238] ss:$28 sps:$4 sm:$0xff]   ;;  %v3908_v42 = vld [vmem:[%s5478_s4 + $0x584] ss:$28 sps:$4 sm:$0xff]  }
 0x2a2   :  { %2523 = vmatprep.mubr.bf16.mxu0 %v4914_v55  ;;  %2596 = vmatprep.mubr.bf16.mxu1 %v4916_v56  ;;  %v3894_v20 = vld [vmem:[%s5478_s4 + $0x5f0] ss:$28 sps:$4 sm:$0xff]   ;;  %v3900_v39 = vld [vmem:[%s5478_s4 + $0x5b8] ss:$28 sps:$4 sm:$0xff]   ;;  %v3903_v43 = vld [vmem:[%s5478_s4 + $0x200] ss:$28 sps:$4 sm:$0xff]  }
 0x2a3   :  { %2692 = vmatprep.subr.bf16.mxu1 %v3860_v45  ;;  %2524 = vmatmul.mubr.bf16.gmra.mxu0 %v4907_v26  ;;  %v3906_v27 = vld [vmem:[%s5478_s4 + $0x580] ss:$28 sps:$4 sm:$0xff]   ;;  %v3911_v44 = vld [vmem:[%s5478_s4 + $0x1cc] ss:$28 sps:$4 sm:$0xff]   ;;  %v3915_v25 = vld [vmem:[%s5478_s4 + $0x198] ss:$28 sps:$4 sm:$0xff]  }
 0x2a4   :  { %2597 = vmatmul.mubr.bf16.gmra.mxu1 %v4912_v52  ;;  %2620 = vmatpush1.bf16.msra.mxu0 %v3855_v59  ;;  %v3914_v28 = vld [vmem:[%s5478_s4 + $0x54c] ss:$28 sps:$4 sm:$0xff]   ;;  %v3917_v49 = vld [vmem:[%s5478_s4 + $0x19c] ss:$28 sps:$4 sm:$0xff]   ;;  %v3923_v45 = vld [vmem:[%s5478_s4 + $0x164] ss:$28 sps:$4 sm:$0xff]  }
 0x2a5   :  { %2693 = vmatpush1.bf16.msra.mxu1 %v3858_v60  ;;  %2639 = vmatprep.mubr.bf16.mxu0 %v4778_v53  ;;  %v3909_v46 = vld [vmem:[%s5478_s4 + $0x1c8] ss:$28 sps:$4 sm:$0xff]   ;;  %v3920_v50 = vld [vmem:[%s5478_s4 + $0x51c] ss:$28 sps:$4 sm:$0xff]  }
 0x2a6   :  { %2712 = vmatprep.mubr.bf16.mxu1 %v4780_v54  ;;  %2621 = vmatprep.subr.bf16.mxu0 %v3863_v61  ;;  %v3912_v48 = vld [vmem:[%s5478_s4 + $0x548] ss:$28 sps:$4 sm:$0xff]   ;;  %v3918_v51 = vld [vmem:[%s5478_s4 + $0x518] ss:$28 sps:$4 sm:$0xff]   ;;  %v3921_v60 = vld [vmem:[%s5478_s4 + $0x160] ss:$28 sps:$4 sm:$0xff]  }
 0x2a7   :  { %2694 = vmatprep.subr.bf16.mxu1 %v3866_v62  ;;  %v3926_v59 = vld [vmem:[%s5478_s4 + $0x4e4] ss:$28 sps:$4 sm:$0xff]   ;;  %v3929_v62 = vld [vmem:[%s5478_s4 + $0x12c] ss:$28 sps:$4 sm:$0xff]  }
 0x2a8   :  { %2622 = vmatpush1.bf16.msra.mxu0 %v3861_v63  ;;  %v3924_v61 = vld [vmem:[%s5478_s4 + $0x4e0] ss:$28 sps:$4 sm:$0xff]   ;;  %v3932_v63 = vld [vmem:[%s5478_s4 + $0x4ac] ss:$28 sps:$4 sm:$0xff]  }
 0x2a9   :  { %2695 = vmatpush1.bf16.msra.mxu1 %v3864_v0  ;;  %2623 = vmatprep.subr.bf16.mxu0 %v3869_v1  ;;  %v3927_v0 = vld [vmem:[%s5478_s4 + $0x128] ss:$28 sps:$4 sm:$0xff]  }
 0x2aa   :  { %2696 = vmatprep.subr.bf16.mxu1 %v3872_v2  ;;  %v3930_v1 = vld [vmem:[%s5478_s4 + $0x4a8] ss:$28 sps:$4 sm:$0xff]   ;;  %v3935_v2 = vld [vmem:[%s5478_s4 + $0xf4] ss:$28 sps:$4 sm:$0xff]  }
 0x2ac   :  { %2624 = vmatpush2.bf16.msra.mxu0 %v3867_v3  ;;  %v3938_v3 = vld [vmem:[%s5478_s4 + $0x474] ss:$28 sps:$4 sm:$0xff]  }
 0x2ad   :  { %2697 = vmatpush2.bf16.msra.mxu1 %v3870_v4  ;;  %2625 = vmatprep.subr.bf16.mxu0 %v3875_v5  ;;  %v3933_v4 = vld [vmem:[%s5478_s4 + $0xf0] ss:$28 sps:$4 sm:$0xff]  }
 0x2ae   :  { %2698 = vmatprep.subr.bf16.mxu1 %v3878_v6  ;;  %v3936_v5 = vld [vmem:[%s5478_s4 + $0x470] ss:$28 sps:$4 sm:$0xff]   ;;  %v3941_v6 = vld [vmem:[%s5478_s4 + $0xbc] ss:$28 sps:$4 sm:$0xff]  }
 0x2b0   :  { %2626 = vmatpush2.bf16.msra.mxu0 %v3873_v9  ;;  %v3944_v9 = vld [vmem:[%s5478_s4 + $0x43c] ss:$28 sps:$4 sm:$0xff]  }
 0x2b1   :  { %2699 = vmatpush2.bf16.msra.mxu1 %v3876_v10  ;;  %2627 = vmatprep.subr.bf16.mxu0 %v3881_v11  ;;  %v3939_v10 = vld [vmem:[%s5478_s4 + $0xb8] ss:$28 sps:$4 sm:$0xff]  }
 0x2b2   :  { %2700 = vmatprep.subr.bf16.mxu1 %v3884_v12  ;;  %v3942_v11 = vld [vmem:[%s5478_s4 + $0x438] ss:$28 sps:$4 sm:$0xff]   ;;  %v3947_v12 = vld [vmem:[%s5478_s4 + $0x84] ss:$28 sps:$4 sm:$0xff]  }
 0x2b4   :  { %2628 = vmatpush2.bf16.msra.mxu0 %v3879_v13  ;;  %v3950_v13 = vld [vmem:[%s5478_s4 + $0x404] ss:$28 sps:$4 sm:$0xff]  }
 0x2b5   :  { %2701 = vmatpush2.bf16.msra.mxu1 %v3882_v23  ;;  %2629 = vmatprep.subr.bf16.mxu0 %v3887_v24  ;;  %v3945_v23 = vld [vmem:[%s5478_s4 + $0x80] ss:$28 sps:$4 sm:$0xff]  }
 0x2b6   :  { %2702 = vmatprep.subr.bf16.mxu1 %v3890_v29  ;;  %v3948_v24 = vld [vmem:[%s5478_s4 + $0x400] ss:$28 sps:$4 sm:$0xff]   ;;  %v3953_v29 = vld [vmem:[%s5478_s4 + $0x4c] ss:$28 sps:$4 sm:$0xff]  }
 0x2b8   :  { %2630 = vmatpush2.bf16.msra.mxu0 %v3885_v30  ;;  %v3956_v30 = vld [vmem:[%s5478_s4 + $0x3cc] ss:$28 sps:$4 sm:$0xff]  }
 0x2b9   :  { %2703 = vmatpush2.bf16.msra.mxu1 %v3888_v31  ;;  %2631 = vmatprep.subr.bf16.mxu0 %v3893_v32  ;;  %v3951_v31 = vld [vmem:[%s5478_s4 + $0x48] ss:$28 sps:$4 sm:$0xff]  }
 0x2ba   :  { %2704 = vmatprep.subr.bf16.mxu1 %v3896_v33  ;;  %v3954_v32 = vld [vmem:[%s5478_s4 + $0x3c8] ss:$28 sps:$4 sm:$0xff]   ;;  %v3959_v33 = vld [vmem:[%s5478_s4 + $0x14] ss:$28 sps:$4 sm:$0xff]  }
 0x2bc   :  { %2632 = vmatpush2.bf16.msra.mxu0 %v3891_v34  ;;  %v3962_v34 = vld [vmem:[%s5478_s4 + $0x394] ss:$28 sps:$4 sm:$0xff]  }
 0x2bd   :  { %2705 = vmatpush2.bf16.msra.mxu1 %v3894_v20  ;;  %2633 = vmatprep.subr.bf16.mxu0 %v3899_v35  ;;  %v3957_v20 = vld [vmem:[%s5478_s4 + $0x10] ss:$28 sps:$4 sm:$0xff]  }
 0x2be   :  { %2706 = vmatprep.subr.bf16.mxu1 %v3902_v19  ;;  %v3960_v35 = vld [vmem:[%s5478_s4 + $0x390] ss:$28 sps:$4 sm:$0xff]   ;;  %v3965_v19 = vld [vmem:[%s5478_s4 + $0x35c] ss:$28 sps:$4 sm:$0xff]  }
 0x2c0   :  { %2634 = vmatpush2.bf16.msra.mxu0 %v3897_v38  ;;  %v3968_v38 = vld [vmem:[%s5478_s4 + $0x6dc] ss:$28 sps:$4 sm:$0xff]  }
 0x2c1   :  { %2707 = vmatpush2.bf16.msra.mxu1 %v3900_v39  ;;  %2635 = vmatprep.subr.bf16.mxu0 %v3905_v40  ;;  %v3963_v39 = vld [vmem:[%s5478_s4 + $0x358] ss:$28 sps:$4 sm:$0xff]  }
 0x2c2   :  { %2708 = vmatprep.subr.bf16.mxu1 %v3908_v42  ;;  %v3966_v40 = vld [vmem:[%s5478_s4 + $0x6d8] ss:$28 sps:$4 sm:$0xff]   ;;  %v3971_v42 = vld [vmem:[%s5478_s4 + $0x324] ss:$28 sps:$4 sm:$0xff]  }
 0x2c4   :  { %2636 = vmatpush2.bf16.msra.mxu0 %v3903_v43  ;;  %v3974_v43 = vld [vmem:[%s5478_s4 + $0x6a4] ss:$28 sps:$4 sm:$0xff]  }
 0x2c5   :  { %2709 = vmatpush2.bf16.msra.mxu1 %v3906_v27  ;;  %2637 = vmatprep.subr.bf16.mxu0 %v3911_v44  ;;  %v3969_v27 = vld [vmem:[%s5478_s4 + $0x320] ss:$28 sps:$4 sm:$0xff]  }
 0x2c6   :  { %2710 = vmatprep.subr.bf16.mxu1 %v3914_v28  ;;  %v3972_v44 = vld [vmem:[%s5478_s4 + $0x6a0] ss:$28 sps:$4 sm:$0xff]   ;;  %v3977_v28 = vld [vmem:[%s5478_s4 + $0x2ec] ss:$28 sps:$4 sm:$0xff]  }
 0x2c8   :  { %2638 = vmatpush2.bf16.msra.mxu0 %v3909_v46  ;;  %v3980_v46 = vld [vmem:[%s5478_s4 + $0x66c] ss:$28 sps:$4 sm:$0xff]  }
 0x2c9   :  { %2711 = vmatpush2.bf16.msra.mxu1 %v3912_v48  ;;  %2753 = vmatprep.subr.bf16.mxu0 %v3917_v49  ;;  %v3975_v48 = vld [vmem:[%s5478_s4 + $0x2e8] ss:$28 sps:$4 sm:$0xff]  }
 0x2ca   :  { %2826 = vmatprep.subr.bf16.mxu1 %v3920_v50  ;;  %v3978_v49 = vld [vmem:[%s5478_s4 + $0x668] ss:$28 sps:$4 sm:$0xff]   ;;  %v3983_v50 = vld [vmem:[%s5478_s4 + $0x2b4] ss:$28 sps:$4 sm:$0xff]  }
 0x2cb   :  { %2640 = vmatmul.mubr.bf16.vlgmr.msra.gmra.mxu0 %v4788_v57 }
 0x2cc   :  { %2713 = vmatmul.mubr.bf16.vlgmr.msra.gmra.mxu1 %v4790_v58  ;;  %2649 = vmatprep.mubr.bf16.mxu0 %v4824_v36 }
 0x2cd   :  { %2722 = vmatprep.mubr.bf16.mxu1 %v4826_v37  ;;  %2754 = vmatpush1.bf16.msra.mxu0 %v3915_v25  ;;  %v3986_v25 = vld [vmem:[%s5478_s4 + $0x634] ss:$28 sps:$4 sm:$0xff]  }
 0x2ce   :  { %2827 = vmatpush1.bf16.msra.mxu1 %v3918_v51  ;;  %2755 = vmatprep.subr.bf16.mxu0 %v3923_v45  ;;  %v3981_v51 = vld [vmem:[%s5478_s4 + $0x2b0] ss:$28 sps:$4 sm:$0xff]  }
 0x2cf   :  { %2828 = vmatprep.subr.bf16.mxu1 %v3926_v59  ;;  %v3984_v45 = vld [vmem:[%s5478_s4 + $0x630] ss:$28 sps:$4 sm:$0xff]   ;;  %v3989_v59 = vld [vmem:[%s5478_s4 + $0x27c] ss:$28 sps:$4 sm:$0xff]  }
 0x2d1   :  { %2756 = vmatpush1.bf16.msra.mxu0 %v3921_v60  ;;  %v3992_v60 = vld [vmem:[%s5478_s4 + $0x5fc] ss:$28 sps:$4 sm:$0xff]  }
 0x2d2   :  { %2829 = vmatpush1.bf16.msra.mxu1 %v3924_v61  ;;  %2757 = vmatprep.subr.bf16.mxu0 %v3929_v62  ;;  %v3987_v61 = vld [vmem:[%s5478_s4 + $0x278] ss:$28 sps:$4 sm:$0xff]  }
 0x2d3   :  { %2650 = vmatmul.mubr.bf16.gmra.mxu0 %v4833_v41  ;;  %2830 = vmatprep.subr.bf16.mxu1 %v3932_v63  ;;  %v3990_v62 = vld [vmem:[%s5478_s4 + $0x5f8] ss:$28 sps:$4 sm:$0xff]   ;;  %v3995_v63 = vld [vmem:[%s5478_s4 + $0x244] ss:$28 sps:$4 sm:$0xff]  }
 0x2d4   :  { %2723 = vmatmul.mubr.bf16.gmra.mxu1 %v4841_v47  ;;  %2659 = vmatprep.mubr.bf16.mxu0 %v4872_v17 }
 0x2d5   :  { %2732 = vmatprep.mubr.bf16.mxu1 %v4874_v22  ;;  %2758 = vmatpush1.bf16.msra.mxu0 %v3927_v0  ;;  %v3998_v0 = vld [vmem:[%s5478_s4 + $0x5c4] ss:$28 sps:$4 sm:$0xff]  }
 0x2d6   :  { %2831 = vmatpush1.bf16.msra.mxu1 %v3930_v1  ;;  %2759 = vmatprep.subr.bf16.mxu0 %v3935_v2  ;;  %v3993_v1 = vld [vmem:[%s5478_s4 + $0x240] ss:$28 sps:$4 sm:$0xff]  }
 0x2d7   :  { %2832 = vmatprep.subr.bf16.mxu1 %v3938_v3  ;;  %v3996_v2 = vld [vmem:[%s5478_s4 + $0x5c0] ss:$28 sps:$4 sm:$0xff]   ;;  %v4001_v3 = vld [vmem:[%s5478_s4 + $0x20c] ss:$28 sps:$4 sm:$0xff]  }
 0x2d9   :  { %2760 = vmatpush1.bf16.msra.mxu0 %v3933_v4  ;;  %v4004_v4 = vld [vmem:[%s5478_s4 + $0x58c] ss:$28 sps:$4 sm:$0xff]  }
 0x2da   :  { %2833 = vmatpush1.bf16.msra.mxu1 %v3936_v5  ;;  %2761 = vmatprep.subr.bf16.mxu0 %v3941_v6  ;;  %v3999_v5 = vld [vmem:[%s5478_s4 + $0x208] ss:$28 sps:$4 sm:$0xff]  }
 0x2db   :  { %2660 = vmatmul.mubr.bf16.gmra.mxu0 %v4863_v7  ;;  %2834 = vmatprep.subr.bf16.mxu1 %v3944_v9  ;;  %v4002_v6 = vld [vmem:[%s5478_s4 + $0x588] ss:$28 sps:$4 sm:$0xff]   ;;  %v4007_v9 = vld [vmem:[%s5478_s4 + $0x1d4] ss:$28 sps:$4 sm:$0xff]  }
 0x2dc   :  { %2733 = vmatmul.mubr.bf16.gmra.mxu1 %v4865_v8  ;;  %2669 = vmatprep.mubr.bf16.mxu0 %v4914_v55 }
 0x2dd   :  { %2742 = vmatprep.mubr.bf16.mxu1 %v4916_v56  ;;  %2762 = vmatpush1.bf16.msra.mxu0 %v3939_v10  ;;  %v4010_v10 = vld [vmem:[%s5478_s4 + $0x554] ss:$28 sps:$4 sm:$0xff]  }
 0x2de   :  { %2835 = vmatpush1.bf16.msra.mxu1 %v3942_v11  ;;  %2763 = vmatprep.subr.bf16.mxu0 %v3947_v12  ;;  %v4005_v11 = vld [vmem:[%s5478_s4 + $0x1d0] ss:$28 sps:$4 sm:$0xff]  }
 0x2df   :  { %2836 = vmatprep.subr.bf16.mxu1 %v3950_v13  ;;  %v4008_v12 = vld [vmem:[%s5478_s4 + $0x550] ss:$28 sps:$4 sm:$0xff]   ;;  %v4011_v13 = vld [vmem:[%s5478_s4 + $0x360] ss:$28 sps:$4 sm:$0xff]  }
 0x2e1   :  { %2764 = vmatpush1.bf16.msra.mxu0 %v3945_v23  ;;  %v4012_v23 = vld [vmem:[%s5478_s4 + $0x6e0] ss:$28 sps:$4 sm:$0xff]  }
 0x2e2   :  { %2837 = vmatpush1.bf16.msra.mxu1 %v3948_v24  ;;  %2765 = vmatprep.subr.bf16.mxu0 %v3953_v29  ;;  %v4013_v24 = vld [vmem:[%s5478_s4 + $0x1a0] ss:$28 sps:$4 sm:$0xff]  }
 0x2e3   :  { %2670 = vmatmul.mubr.bf16.gmra.mxu0 %v4907_v26  ;;  %2838 = vmatprep.subr.bf16.mxu1 %v3956_v30  ;;  %v4014_v29 = vld [vmem:[%s5478_s4 + $0x520] ss:$28 sps:$4 sm:$0xff]   ;;  %v4015_v30 = vld [vmem:[%s5478_s4 + $0x328] ss:$28 sps:$4 sm:$0xff]  }
 0x2e4   :  { %2743 = vmatmul.mubr.bf16.gmra.mxu1 %v4912_v52  ;;  %2785 = vmatprep.mubr.bf16.mxu0 %v4778_v53 }
 0x2e5   :  { %2766 = vmatpush1.bf16.msra.mxu0 %v3951_v31  ;;  %2858 = vmatprep.mubr.bf16.mxu1 %v4780_v54  ;;  %v4016_v31 = vld [vmem:[%s5478_s4 + $0x6a8] ss:$28 sps:$4 sm:$0xff]  }
 0x2e6   :  { %2839 = vmatpush1.bf16.msra.mxu1 %v3954_v32  ;;  %2767 = vmatprep.subr.bf16.mxu0 %v3959_v33  ;;  %v4017_v32 = vld [vmem:[%s5478_s4 + $0x168] ss:$28 sps:$4 sm:$0xff]  }
 0x2e7   :  { %2840 = vmatprep.subr.bf16.mxu1 %v3962_v34  ;;  %v4018_v33 = vld [vmem:[%s5478_s4 + $0x4e8] ss:$28 sps:$4 sm:$0xff]   ;;  %v4019_v34 = vld [vmem:[%s5478_s4 + $0x2f0] ss:$28 sps:$4 sm:$0xff]  }
 0x2e9   :  { %2768 = vmatpush1.bf16.msra.mxu0 %v3957_v20  ;;  %v4020_v20 = vld [vmem:[%s5478_s4 + $0x670] ss:$28 sps:$4 sm:$0xff]  }
 0x2ea   :  { %2841 = vmatpush1.bf16.msra.mxu1 %v3960_v35  ;;  %2769 = vmatprep.subr.bf16.mxu0 %v3965_v19  ;;  %v4021_v35 = vld [vmem:[%s5478_s4 + $0x130] ss:$28 sps:$4 sm:$0xff]  }
 0x2eb   :  { %2842 = vmatprep.subr.bf16.mxu1 %v3968_v38  ;;  %v4022_v19 = vld [vmem:[%s5478_s4 + $0x4b0] ss:$28 sps:$4 sm:$0xff]   ;;  %v4023_v38 = vld [vmem:[%s5478_s4 + $0x2b8] ss:$28 sps:$4 sm:$0xff]  }
 0x2ed   :  { %2770 = vmatpush2.bf16.msra.mxu0 %v3963_v39  ;;  %v4024_v39 = vld [vmem:[%s5478_s4 + $0x638] ss:$28 sps:$4 sm:$0xff]  }
 0x2ee   :  { %2843 = vmatpush2.bf16.msra.mxu1 %v3966_v40  ;;  %2771 = vmatprep.subr.bf16.mxu0 %v3971_v42  ;;  %v4025_v40 = vld [vmem:[%s5478_s4 + $0xf8] ss:$28 sps:$4 sm:$0xff]  }
 0x2ef   :  { %2844 = vmatprep.subr.bf16.mxu1 %v3974_v43  ;;  %v4026_v42 = vld [vmem:[%s5478_s4 + $0x478] ss:$28 sps:$4 sm:$0xff]   ;;  %v4027_v43 = vld [vmem:[%s5478_s4 + $0x280] ss:$28 sps:$4 sm:$0xff]  }
 0x2f1   :  { %2772 = vmatpush2.bf16.msra.mxu0 %v3969_v27  ;;  %v4028_v27 = vld [vmem:[%s5478_s4 + $0x600] ss:$28 sps:$4 sm:$0xff]  }
 0x2f2   :  { %2845 = vmatpush2.bf16.msra.mxu1 %v3972_v44  ;;  %2773 = vmatprep.subr.bf16.mxu0 %v3977_v28  ;;  %v4029_v44 = vld [vmem:[%s5478_s4 + $0xc0] ss:$28 sps:$4 sm:$0xff]  }
 0x2f3   :  { %2846 = vmatprep.subr.bf16.mxu1 %v3980_v46  ;;  %v4030_v28 = vld [vmem:[%s5478_s4 + $0x440] ss:$28 sps:$4 sm:$0xff]   ;;  %v4031_v46 = vld [vmem:[%s5478_s4 + $0x248] ss:$28 sps:$4 sm:$0xff]  }
 0x2f5   :  { %2774 = vmatpush2.bf16.msra.mxu0 %v3975_v48  ;;  %v4032_v48 = vld [vmem:[%s5478_s4 + $0x5c8] ss:$28 sps:$4 sm:$0xff]  }
 0x2f6   :  { %2847 = vmatpush2.bf16.msra.mxu1 %v3978_v49  ;;  %2775 = vmatprep.subr.bf16.mxu0 %v3983_v50  ;;  %v4033_v49 = vld [vmem:[%s5478_s4 + $0x88] ss:$28 sps:$4 sm:$0xff]  }
 0x2f7   :  { %2848 = vmatprep.subr.bf16.mxu1 %v3986_v25  ;;  %v4034_v50 = vld [vmem:[%s5478_s4 + $0x408] ss:$28 sps:$4 sm:$0xff]   ;;  %v4035_v25 = vld [vmem:[%s5478_s4 + $0x210] ss:$28 sps:$4 sm:$0xff]  }
 0x2f9   :  { %2776 = vmatpush2.bf16.msra.mxu0 %v3981_v51  ;;  %v4036_v51 = vld [vmem:[%s5478_s4 + $0x590] ss:$28 sps:$4 sm:$0xff]  }
 0x2fa   :  { %2849 = vmatpush2.bf16.msra.mxu1 %v3984_v45  ;;  %2777 = vmatprep.subr.bf16.mxu0 %v3989_v59  ;;  %v4037_v45 = vld [vmem:[%s5478_s4 + $0x50] ss:$28 sps:$4 sm:$0xff]  }
 0x2fb   :  { %2850 = vmatprep.subr.bf16.mxu1 %v3992_v60  ;;  %v4038_v59 = vld [vmem:[%s5478_s4 + $0x3d0] ss:$28 sps:$4 sm:$0xff]   ;;  %v4039_v60 = vld [vmem:[%s5478_s4 + $0x1d8] ss:$28 sps:$4 sm:$0xff]  }
 0x2fd   :  { %2778 = vmatpush2.bf16.msra.mxu0 %v3987_v61  ;;  %v4040_v61 = vld [vmem:[%s5478_s4 + $0x558] ss:$28 sps:$4 sm:$0xff]  }
 0x2fe   :  { %2851 = vmatpush2.bf16.msra.mxu1 %v3990_v62  ;;  %2779 = vmatprep.subr.bf16.mxu0 %v3995_v63  ;;  %v4041_v62 = vld [vmem:[%s5478_s4 + $0x18] ss:$28 sps:$4 sm:$0xff]  }
 0x2ff   :  { %2852 = vmatprep.subr.bf16.mxu1 %v3998_v0  ;;  %v4042_v63 = vld [vmem:[%s5478_s4 + $0x398] ss:$28 sps:$4 sm:$0xff]  }
 0x301   :  { %2780 = vmatpush2.bf16.msra.mxu0 %v3993_v1 }
 0x302   :  { %2853 = vmatpush2.bf16.msra.mxu1 %v3996_v2  ;;  %2781 = vmatprep.subr.bf16.mxu0 %v4001_v3 }
 0x303   :  { %2854 = vmatprep.subr.bf16.mxu1 %v4004_v4 }
 0x305   :  { %2782 = vmatpush2.bf16.msra.mxu0 %v3999_v5 }
 0x306   :  { %2855 = vmatpush2.bf16.msra.mxu1 %v4002_v6  ;;  %2783 = vmatprep.subr.bf16.mxu0 %v4007_v9 }
 0x307   :  { %2856 = vmatprep.subr.bf16.mxu1 %v4010_v10 }
 0x309   :  { %2784 = vmatpush2.bf16.msra.mxu0 %v4005_v11 }
 0x30a   :  { %2857 = vmatpush2.bf16.msra.mxu1 %v4008_v12  ;;  %3486 = vmatprep.subr.bf16.mxu0 %v4011_v13 }
 0x30b   :  { %3526 = vmatprep.subr.bf16.mxu1 %v4012_v23 }
 0x30c   :  { %2786 = vmatmul.mubr.bf16.vlgmr.msra.gmra.mxu0 %v4788_v57 }
 0x30d   :  { %2859 = vmatmul.mubr.bf16.vlgmr.msra.gmra.mxu1 %v4790_v58  ;;  %2795 = vmatprep.mubr.bf16.mxu0 %v4824_v36 }
 0x30e   :  { %2868 = vmatprep.mubr.bf16.mxu1 %v4826_v37  ;;  %3487 = vmatpush3.bf16.msra.mxu0 %v4013_v24 }
 0x30f   :  { %3527 = vmatpush3.bf16.msra.mxu1 %v4014_v29  ;;  %3488 = vmatprep.subr.bf16.mxu0 %v4015_v30 }
 0x310   :  { %3528 = vmatprep.subr.bf16.mxu1 %v4016_v31 }
 0x312   :  { %3489 = vmatpush3.bf16.msra.mxu0 %v4017_v32 }
 0x313   :  { %3529 = vmatpush3.bf16.msra.mxu1 %v4018_v33  ;;  %3490 = vmatprep.subr.bf16.mxu0 %v4019_v34 }
 0x314   :  { %2796 = vmatmul.mubr.bf16.gmra.mxu0 %v4833_v41  ;;  %3530 = vmatprep.subr.bf16.mxu1 %v4020_v20 }
 0x315   :  { %2869 = vmatmul.mubr.bf16.gmra.mxu1 %v4841_v47  ;;  %2805 = vmatprep.mubr.bf16.mxu0 %v4872_v17 }
 0x316   :  { %2878 = vmatprep.mubr.bf16.mxu1 %v4874_v22  ;;  %3491 = vmatpush3.bf16.msra.mxu0 %v4021_v35 }
 0x317   :  { %3531 = vmatpush3.bf16.msra.mxu1 %v4022_v19  ;;  %3492 = vmatprep.subr.bf16.mxu0 %v4023_v38 }
 0x318   :  { %3532 = vmatprep.subr.bf16.mxu1 %v4024_v39 }
 0x31a   :  { %3493 = vmatpush3.bf16.msra.mxu0 %v4025_v40 }
 0x31b   :  { %3533 = vmatpush3.bf16.msra.mxu1 %v4026_v42  ;;  %3494 = vmatprep.subr.bf16.mxu0 %v4027_v43 }
 0x31c   :  { %2806 = vmatmul.mubr.bf16.gmra.mxu0 %v4863_v7  ;;  %3534 = vmatprep.subr.bf16.mxu1 %v4028_v27 }
 0x31d   :  { %2879 = vmatmul.mubr.bf16.gmra.mxu1 %v4865_v8  ;;  %2815 = vmatprep.mubr.bf16.mxu0 %v4914_v55 }
 0x31e   :  { %2888 = vmatprep.mubr.bf16.mxu1 %v4916_v56  ;;  %3495 = vmatpush3.bf16.msra.mxu0 %v4029_v44 }
 0x31f   :  { %3535 = vmatpush3.bf16.msra.mxu1 %v4030_v28  ;;  %3496 = vmatprep.subr.bf16.mxu0 %v4031_v46 }
 0x320   :  { %3536 = vmatprep.subr.bf16.mxu1 %v4032_v48 }
 0x322   :  { %3497 = vmatpush3.bf16.msra.mxu0 %v4033_v49 }
 0x323   :  { %3537 = vmatpush3.bf16.msra.mxu1 %v4034_v50  ;;  %3498 = vmatprep.subr.bf16.mxu0 %v4035_v25 }
 0x324   :  { %2816 = vmatmul.mubr.bf16.gmra.mxu0 %v4907_v26  ;;  %3538 = vmatprep.subr.bf16.mxu1 %v4036_v51 }
 0x325   :  { %2889 = vmatmul.mubr.bf16.gmra.mxu1 %v4912_v52  ;;  %2931 = vmatprep.mubr.bf16.mxu0 %v4778_v53  ;;  %v5374_v53 = vld [vmem:[%s5479_s5 + $0x3] ss:$4 sm:$0x7f]  ;;  %s4179_s5 = smov [#allocation3]  }
 0x326   :  { %3499 = vmatpush3.bf16.msra.mxu0 %v4037_v45  ;;  %2996 = vmatprep.mubr.bf16.mxu1 %v4780_v54  ;;  %v5379_v54 = vrot.slane %v5374_v53, %v4532_v16  ;;  %s3147_s9 = sshll.u32 %s4179_s5, 4  ;;  %s3148_s9 = int_to_ptr.vmem [resolvable:$true] %s3147_s9 }
 0x327   :  { %3539 = vmatpush3.bf16.msra.mxu1 %v4038_v59  ;;  %3500 = vmatprep.subr.bf16.mxu0 %v4039_v60  ;;  %s4155_s10 = scalar_lea.vmem %s3148_s9, 7168  ;;  %p4160_p1 = scmp.lt.s32.totalorder %s3148_s9, %s3148_s9 }
 0x328   :  { %3540 = vmatprep.subr.bf16.mxu1 %v4040_v61  ;;  %p4156_p0 = scmp.ne.s32.totalorder %s3148_s9, %s4155_s10  ;;  %p4161_p2 = scmp.lt.s32.totalorder %s4155_s10, %s4155_s10 }
 0x32a   :  { %3501 = vmatpush3.bf16.msra.mxu0 %v4041_v62  ;;  %p4162_p3 = por %p4161_p2, %p4160_p1 }
 0x32b   :  { %3541 = vmatpush3.bf16.msra.mxu1 %v4042_v63 }
 0x32c   :  { %p4163_p4 = pnand %p4162_p3, %p4156_p0 }
 0x32d   :  { %2932 = vmatmul.mubr.bf16.vlgmr.msra.gmra.mxu0 %v4788_v57  ;;  %v5383_v57 = vrot.slane %v5374_v53, %v4529_v15 }
 0x32e   :  { %2997 = vmatmul.mubr.bf16.vlgmr.msra.gmra.mxu1 %v4790_v58  ;;  %2939 = vmatprep.mubr.bf16.mxu0 %v4824_v36 }
 0x32f   :  { %3004 = vmatprep.mubr.bf16.mxu1 %v4826_v37 }
 0x335   :  { %2940 = vmatmul.mubr.bf16.gmra.mxu0 %v4833_v41 }
 0x336   :  { %3005 = vmatmul.mubr.bf16.gmra.mxu1 %v4841_v47  ;;  %2947 = vmatprep.mubr.bf16.mxu0 %v4872_v17 }
 0x337   :  { %3012 = vmatprep.mubr.bf16.mxu1 %v4874_v22 }
 0x33d   :  { %2948 = vmatmul.mubr.bf16.gmra.mxu0 %v4863_v7 }
 0x33e   :  { %3013 = vmatmul.mubr.bf16.gmra.mxu1 %v4865_v8  ;;  %2955 = vmatprep.mubr.bf16.mxu0 %v4914_v55 }
 0x33f   :  { %3020 = vmatprep.mubr.bf16.mxu1 %v4916_v56 }
 0x345   :  { %2956 = vmatmul.mubr.bf16.gmra.mxu0 %v4907_v26 }
 0x346   :  { %3021 = vmatmul.mubr.bf16.gmra.mxu1 %v4912_v52 }
 0x34b   :  { %v2495_v58 = vpop.f32.mrf.mxu0  ;;  %v2568_v36 = vpop.f32.mrf.mxu1 }
 0x34c   :  { %v2496_v37 = vadd.f32 %v2495_v58, %v5379_v54 }
 0x34d   :  { %v2497_v41 = vpop.f32.mrf.mxu0  ;;  %v2570_v47 = vpop.f32.mrf.mxu1 }
 0x34e   :  { %v2569_v7 = vadd.f32 %v2568_v36, %v2496_v37  ;;  %v2498_v8 = vadd.f32 %v2497_v41, %v5383_v57 }
 0x34f   :  { %v2499_v17 = vpop.f32.mrf.mxu0  ;;  %v2572_v22 = vpop.f32.mrf.mxu1 }
 0x350   :  { %4043 = vtanh.f32 %v2569_v7  ;;  %v2571_v26 = vadd.f32 %v2570_v47, %v2498_v8  ;;  %v2500_v16 = vadd.f32 %v2499_v17, %v5379_v54 }
 0x351   :  { %v2501_v52 = vpop.f32.mrf.mxu0  ;;  %v2574_v55 = vpop.f32.mrf.mxu1 }
 0x352   :  { %4045 = vtanh.f32 %v2571_v26  ;;  %v2573_v15 = vadd.f32 %v2572_v22, %v2500_v16  ;;  %v2502_v56 = vadd.f32 %v2501_v52, %v5383_v57 }
 0x353   :  { %v2505_v0 = vpop.f32.mrf.mxu0 }
 0x354   :  { %4047 = vtanh.f32 %v2573_v15  ;;  %v2575_v1 = vadd.f32 %v2574_v55, %v2502_v56  ;;  %v2506_v2 = vadd.f32 %v2505_v0, %v5379_v54  ;;  %v2578_v3 = vpop.f32.mrf.mxu1 }
 0x355   :  { %v2507_v4 = vpop.f32.mrf.mxu0 }
 0x356   :  { %4049 = vtanh.f32 %v2575_v1  ;;  %v2579_v5 = vadd.f32 %v2578_v3, %v2506_v2  ;;  %v2508_v6 = vadd.f32 %v2507_v4, %v5383_v57  ;;  %v2580_v9 = vpop.f32.mrf.mxu1 }
 0x357   :  { %v2509_v10 = vpop.f32.mrf.mxu0 }
 0x358   :  { %4051 = vtanh.f32 %v2579_v5  ;;  %v2581_v11 = vadd.f32 %v2580_v9, %v2508_v6  ;;  %v2510_v12 = vadd.f32 %v2509_v10, %v5379_v54  ;;  %v2582_v13 = vpop.f32.mrf.mxu1  ;;  %v5404_v5 = vrot.slane %v5374_v53, %v491_v21 }
 0x359   :  { %v2511_v23 = vpop.f32.mrf.mxu0  ;;  %v5409_v6 = vrot.slane %v5374_v53, %v495_v18 }
 0x35a   :  { %4053 = vtanh.f32 %v2581_v11  ;;  %v2583_v24 = vadd.f32 %v2582_v13, %v2510_v12  ;;  %v2512_v29 = vadd.f32 %v2511_v23, %v5383_v57  ;;  %v2584_v30 = vpop.f32.mrf.mxu1 }
 0x35b   :  { %v2515_v31 = vpop.f32.mrf.mxu0 }
 0x35c   :  { %4055 = vtanh.f32 %v2583_v24  ;;  %v2585_v32 = vadd.f32 %v2584_v30, %v2512_v29  ;;  %v2516_v33 = vadd.f32 %v2515_v31, %v5379_v54  ;;  %v2588_v34 = vpop.f32.mrf.mxu1 }
 0x35d   :  { %v4044_v20 = vpop.eup %4043  ;;  %v2517_v35 = vpop.f32.mrf.mxu0 }
 0x35e   :  { %3085 = vst [vmem:[#allocation3] sm:$0xff] %v4044_v20  ;;  %4057 = vtanh.f32 %v2585_v32  ;;  %v2589_v19 = vadd.f32 %v2588_v34, %v2516_v33  ;;  %v2518_v38 = vadd.f32 %v2517_v35, %v5383_v57  ;;  %v2590_v39 = vpop.f32.mrf.mxu1 }
 0x35f   :  { %v4046_v40 = vpop.eup %4045  ;;  %v2519_v42 = vpop.f32.mrf.mxu0 }
 0x360   :  { %3086 = vst [vmem:[#allocation3 + $0x8] sm:$0xff] %v4046_v40  ;;  %4059 = vtanh.f32 %v2589_v19  ;;  %v2591_v43 = vadd.f32 %v2590_v39, %v2518_v38  ;;  %v2520_v27 = vadd.f32 %v2519_v42, %v5379_v54  ;;  %v2592_v44 = vpop.f32.mrf.mxu1 }
 0x361   :  { %v4048_v28 = vpop.eup %4047  ;;  %v2521_v46 = vpop.f32.mrf.mxu0 }
 0x362   :  { %3093 = vst [vmem:[#allocation3 + $0x38] sm:$0xff] %v4048_v28  ;;  %4061 = vtanh.f32 %v2591_v43  ;;  %v2593_v48 = vadd.f32 %v2592_v44, %v2520_v27  ;;  %v2522_v49 = vadd.f32 %v2521_v46, %v5383_v57  ;;  %v2594_v50 = vpop.f32.mrf.mxu1 }
 0x363   :  { %v4050_v25 = vpop.eup %4049  ;;  %v2525_v51 = vpop.f32.mrf.mxu0 }
 0x364   :  { %3094 = vst [vmem:[#allocation3 + $0x40] sm:$0xff] %v4050_v25  ;;  %4063 = vtanh.f32 %v2593_v48  ;;  %v2595_v45 = vadd.f32 %v2594_v50, %v2522_v49  ;;  %v2526_v59 = vadd.f32 %v2525_v51, %v5379_v54  ;;  %v2598_v60 = vpop.f32.mrf.mxu1 }
 0x365   :  { %v4052_v61 = vpop.eup %4051  ;;  %v2527_v62 = vpop.f32.mrf.mxu0 }
 0x366   :  { %3100 = vst [vmem:[#allocation3 + $0x70] sm:$0xff] %v4052_v61  ;;  %4065 = vtanh.f32 %v2595_v45  ;;  %v2599_v63 = vadd.f32 %v2598_v60, %v2526_v59  ;;  %v2528_v58 = vadd.f32 %v2527_v62, %v5383_v57  ;;  %v2600_v36 = vpop.f32.mrf.mxu1 }
 0x367   :  { %v4054_v37 = vpop.eup %4053  ;;  %v2529_v41 = vpop.f32.mrf.mxu0 }
 0x368   :  { %3101 = vst [vmem:[#allocation3 + $0x78] sm:$0xff] %v4054_v37  ;;  %4067 = vtanh.f32 %v2599_v63  ;;  %v2601_v47 = vadd.f32 %v2600_v36, %v2528_v58  ;;  %v2530_v7 = vadd.f32 %v2529_v41, %v5379_v54  ;;  %v2602_v8 = vpop.f32.mrf.mxu1 }
 0x369   :  { %v4056_v17 = vpop.eup %4055  ;;  %v2531_v22 = vpop.f32.mrf.mxu0 }
 0x36a   :  { %3107 = vst [vmem:[#allocation3 + $0xa8] sm:$0xff] %v4056_v17  ;;  %4069 = vtanh.f32 %v2601_v47  ;;  %v2603_v26 = vadd.f32 %v2602_v8, %v2530_v7  ;;  %v2532_v16 = vadd.f32 %v2531_v22, %v5383_v57  ;;  %v2604_v55 = vpop.f32.mrf.mxu1 }
 0x36b   :  { %v4058_v52 = vpop.eup %4057 }
 0x36c   :  { %3108 = vst [vmem:[#allocation3 + $0xb0] sm:$0xff] %v4058_v52  ;;  %4071 = vtanh.f32 %v2603_v26  ;;  %v2605_v15 = vadd.f32 %v2604_v55, %v2532_v16 }
 0x36d   :  { %v4060_v56 = vpop.eup %4059 }
 0x36e   :  { %3114 = vst [vmem:[#allocation3 + $0xe0] sm:$0xff] %v4060_v56  ;;  %4073 = vtanh.f32 %v2605_v15 }
 0x36f   :  { %v4062_v0 = vpop.eup %4061 }
 0x370   :  { %3115 = vst [vmem:[#allocation3 + $0xe8] sm:$0xff] %v4062_v0 }
 0x371   :  { %v4064_v1 = vpop.eup %4063 }
 0x372   :  { %3121 = vst [vmem:[#allocation3 + $0x118] sm:$0xff] %v4064_v1 }
 0x373   :  { %v4066_v54 = vpop.eup %4065 }
 0x374   :  { %3122 = vst [vmem:[#allocation3 + $0x120] sm:$0xff] %v4066_v54 }
 0x375   :  { %v4068_v2 = vpop.eup %4067 }
 0x376   :  { %3128 = vst [vmem:[#allocation3 + $0x150] sm:$0xff] %v4068_v2 }
 0x377   :  { %v4070_v3 = vpop.eup %4069 }
 0x378   :  { %3129 = vst [vmem:[#allocation3 + $0x158] sm:$0xff] %v4070_v3 }
 0x379   :  { %v4072_v4 = vpop.eup %4071 }
 0x37a   :  { %3135 = vst [vmem:[#allocation3 + $0x188] sm:$0xff] %v4072_v4 }
 0x37b   :  { %v4074_v57 = vpop.eup %4073 }
 0x37c   :  { %3136 = vst [vmem:[#allocation3 + $0x190] sm:$0xff] %v4074_v57 }
 0x38b   :  { %v2641_v9 = vpop.f32.mrf.mxu0 }
 0x38c   :  { %v2642_v10 = vadd.f32 %v2641_v9, %v5404_v5  ;;  %v2714_v11 = vpop.f32.mrf.mxu1 }
 0x38d   :  { %v2643_v12 = vpop.f32.mrf.mxu0 }
 0x38e   :  { %v2715_v13 = vadd.f32 %v2714_v11, %v2642_v10  ;;  %v2644_v23 = vadd.f32 %v2643_v12, %v5409_v6  ;;  %v2716_v24 = vpop.f32.mrf.mxu1 }
 0x38f   :  { %v2645_v29 = vpop.f32.mrf.mxu0 }
 0x390   :  { %4075 = vtanh.f32 %v2715_v13  ;;  %v2717_v30 = vadd.f32 %v2716_v24, %v2644_v23  ;;  %v2646_v21 = vadd.f32 %v2645_v29, %v5404_v5  ;;  %v2718_v31 = vpop.f32.mrf.mxu1 }
 0x391   :  { %v2647_v32 = vpop.f32.mrf.mxu0 }
 0x392   :  { %4077 = vtanh.f32 %v2717_v30  ;;  %v2719_v33 = vadd.f32 %v2718_v31, %v2646_v21  ;;  %v2648_v18 = vadd.f32 %v2647_v32, %v5409_v6  ;;  %v2720_v34 = vpop.f32.mrf.mxu1 }
 0x393   :  { %v2651_v20 = vpop.f32.mrf.mxu0 }
 0x394   :  { %4079 = vtanh.f32 %v2719_v33  ;;  %v2721_v35 = vadd.f32 %v2720_v34, %v2648_v18  ;;  %v2652_v19 = vadd.f32 %v2651_v20, %v5404_v5  ;;  %v2724_v38 = vpop.f32.mrf.mxu1 }
 0x395   :  { %v2653_v39 = vpop.f32.mrf.mxu0 }
 0x396   :  { %4081 = vtanh.f32 %v2721_v35  ;;  %v2725_v40 = vadd.f32 %v2724_v38, %v2652_v19  ;;  %v2654_v42 = vadd.f32 %v2653_v39, %v5409_v6  ;;  %v2726_v43 = vpop.f32.mrf.mxu1  ;;  %v1292_v38 = vsub.s32 4, %v4526_v14 }
 0x397   :  { %v2655_v27 = vpop.f32.mrf.mxu0  ;;  %v1296_v39 = vsub.s32 5, %v4526_v14 }
 0x398   :  { %4083 = vtanh.f32 %v2725_v40  ;;  %v2727_v44 = vadd.f32 %v2726_v43, %v2654_v42  ;;  %v2656_v28 = vadd.f32 %v2655_v27, %v5404_v5  ;;  %v2728_v46 = vpop.f32.mrf.mxu1  ;;  %v5430_v40 = vrot.slane %v5374_v53, %v1292_v38 }
 0x399   :  { %v2657_v48 = vpop.f32.mrf.mxu0  ;;  %v5433_v42 = vrot.slane %v5374_v53, %v1296_v39 }
 0x39a   :  { %4085 = vtanh.f32 %v2727_v44  ;;  %v2729_v49 = vadd.f32 %v2728_v46, %v2656_v28  ;;  %v2658_v50 = vadd.f32 %v2657_v48, %v5409_v6  ;;  %v2730_v25 = vpop.f32.mrf.mxu1 }
 0x39b   :  { %v2661_v51 = vpop.f32.mrf.mxu0 }
 0x39c   :  { %4087 = vtanh.f32 %v2729_v49  ;;  %v2731_v45 = vadd.f32 %v2730_v25, %v2658_v50  ;;  %v2662_v59 = vadd.f32 %v2661_v51, %v5404_v5  ;;  %v2734_v60 = vpop.f32.mrf.mxu1 }
 0x39d   :  { %v4076_v61 = vpop.eup %4075  ;;  %v2663_v62 = vpop.f32.mrf.mxu0 }
 0x39e   :  { %3087 = vst [vmem:[#allocation3 + $0x10] sm:$0xff] %v4076_v61  ;;  %4089 = vtanh.f32 %v2731_v45  ;;  %v2735_v63 = vadd.f32 %v2734_v60, %v2662_v59  ;;  %v2664_v58 = vadd.f32 %v2663_v62, %v5409_v6  ;;  %v2736_v36 = vpop.f32.mrf.mxu1 }
 0x39f   :  { %v4078_v37 = vpop.eup %4077  ;;  %v2665_v41 = vpop.f32.mrf.mxu0 }
 0x3a0   :  { %3088 = vst [vmem:[#allocation3 + $0x18] sm:$0xff] %v4078_v37  ;;  %4091 = vtanh.f32 %v2735_v63  ;;  %v2737_v47 = vadd.f32 %v2736_v36, %v2664_v58  ;;  %v2666_v7 = vadd.f32 %v2665_v41, %v5404_v5  ;;  %v2738_v8 = vpop.f32.mrf.mxu1 }
 0x3a1   :  { %v4080_v17 = vpop.eup %4079  ;;  %v2667_v22 = vpop.f32.mrf.mxu0 }
 0x3a2   :  { %3095 = vst [vmem:[#allocation3 + $0x48] sm:$0xff] %v4080_v17  ;;  %4093 = vtanh.f32 %v2737_v47  ;;  %v2739_v26 = vadd.f32 %v2738_v8, %v2666_v7  ;;  %v2668_v16 = vadd.f32 %v2667_v22, %v5409_v6  ;;  %v2740_v52 = vpop.f32.mrf.mxu1 }
 0x3a3   :  { %v4082_v55 = vpop.eup %4081  ;;  %v2671_v15 = vpop.f32.mrf.mxu0 }
 0x3a4   :  { %3096 = vst [vmem:[#allocation3 + $0x50] sm:$0xff] %v4082_v55  ;;  %4095 = vtanh.f32 %v2739_v26  ;;  %v2741_v56 = vadd.f32 %v2740_v52, %v2668_v16  ;;  %v2672_v0 = vadd.f32 %v2671_v15, %v5404_v5  ;;  %v2744_v1 = vpop.f32.mrf.mxu1 }
 0x3a5   :  { %v4084_v54 = vpop.eup %4083  ;;  %v2673_v2 = vpop.f32.mrf.mxu0 }
 0x3a6   :  { %3102 = vst [vmem:[#allocation3 + $0x80] sm:$0xff] %v4084_v54  ;;  %4097 = vtanh.f32 %v2741_v56  ;;  %v2745_v3 = vadd.f32 %v2744_v1, %v2672_v0  ;;  %v2674_v4 = vadd.f32 %v2673_v2, %v5409_v6  ;;  %v2746_v57 = vpop.f32.mrf.mxu1 }
 0x3a7   :  { %v4086_v9 = vpop.eup %4085  ;;  %v2675_v10 = vpop.f32.mrf.mxu0 }
 0x3a8   :  { %3103 = vst [vmem:[#allocation3 + $0x88] sm:$0xff] %v4086_v9  ;;  %4099 = vtanh.f32 %v2745_v3  ;;  %v2747_v11 = vadd.f32 %v2746_v57, %v2674_v4  ;;  %v2676_v12 = vadd.f32 %v2675_v10, %v5404_v5  ;;  %v2748_v13 = vpop.f32.mrf.mxu1 }
 0x3a9   :  { %v4088_v23 = vpop.eup %4087  ;;  %v2677_v24 = vpop.f32.mrf.mxu0 }
 0x3aa   :  { %3109 = vst [vmem:[#allocation3 + $0xb8] sm:$0xff] %v4088_v23  ;;  %4101 = vtanh.f32 %v2747_v11  ;;  %v2749_v29 = vadd.f32 %v2748_v13, %v2676_v12  ;;  %v2678_v30 = vadd.f32 %v2677_v24, %v5409_v6  ;;  %v2750_v31 = vpop.f32.mrf.mxu1 }
 0x3ab   :  { %v4090_v21 = vpop.eup %4089 }
 0x3ac   :  { %3110 = vst [vmem:[#allocation3 + $0xc0] sm:$0xff] %v4090_v21  ;;  %4103 = vtanh.f32 %v2749_v29  ;;  %v2751_v32 = vadd.f32 %v2750_v31, %v2678_v30 }
 0x3ad   :  { %v4092_v33 = vpop.eup %4091 }
 0x3ae   :  { %3116 = vst [vmem:[#allocation3 + $0xf0] sm:$0xff] %v4092_v33  ;;  %4105 = vtanh.f32 %v2751_v32 }
 0x3af   :  { %v4094_v18 = vpop.eup %4093 }
 0x3b0   :  { %3117 = vst [vmem:[#allocation3 + $0xf8] sm:$0xff] %v4094_v18 }
 0x3b1   :  { %v4096_v34 = vpop.eup %4095 }
 0x3b2   :  { %3123 = vst [vmem:[#allocation3 + $0x128] sm:$0xff] %v4096_v34 }
 0x3b3   :  { %v4098_v5 = vpop.eup %4097 }
 0x3b4   :  { %3124 = vst [vmem:[#allocation3 + $0x130] sm:$0xff] %v4098_v5 }
 0x3b5   :  { %v4100_v20 = vpop.eup %4099 }
 0x3b6   :  { %3130 = vst [vmem:[#allocation3 + $0x160] sm:$0xff] %v4100_v20 }
 0x3b7   :  { %v4102_v35 = vpop.eup %4101 }
 0x3b8   :  { %3131 = vst [vmem:[#allocation3 + $0x168] sm:$0xff] %v4102_v35 }
 0x3b9   :  { %v4104_v19 = vpop.eup %4103 }
 0x3ba   :  { %3137 = vst [vmem:[#allocation3 + $0x198] sm:$0xff] %v4104_v19 }
 0x3bb   :  { %v4106_v6 = vpop.eup %4105 }
 0x3bc   :  { %3138 = vst [vmem:[#allocation3 + $0x1a0] sm:$0xff] %v4106_v6 }
 0x3cc   :  { %v2787_v43 = vpop.f32.mrf.mxu0 }
 0x3cd   :  { %v2788_v27 = vadd.f32 %v2787_v43, %v5430_v40  ;;  %v2860_v44 = vpop.f32.mrf.mxu1 }
 0x3ce   :  { %v2789_v28 = vpop.f32.mrf.mxu0 }
 0x3cf   :  { %v2861_v46 = vadd.f32 %v2860_v44, %v2788_v27  ;;  %v2790_v48 = vadd.f32 %v2789_v28, %v5433_v42  ;;  %v2862_v49 = vpop.f32.mrf.mxu1 }
 0x3d0   :  { %v2791_v50 = vpop.f32.mrf.mxu0 }
 0x3d1   :  { %4107 = vtanh.f32 %v2861_v46  ;;  %v2863_v25 = vadd.f32 %v2862_v49, %v2790_v48  ;;  %v2792_v51 = vadd.f32 %v2791_v50, %v5430_v40  ;;  %v2864_v45 = vpop.f32.mrf.mxu1  ;;  %v1300_v50 = vsub.s32 6, %v4526_v14 }
 0x3d2   :  { %v2793_v59 = vpop.f32.mrf.mxu0 }
 0x3d3   :  { %4109 = vtanh.f32 %v2863_v25  ;;  %v2865_v60 = vadd.f32 %v2864_v45, %v2792_v51  ;;  %v2794_v61 = vadd.f32 %v2793_v59, %v5433_v42  ;;  %v2866_v62 = vpop.f32.mrf.mxu1 }
 0x3d4   :  { %v2797_v63 = vpop.f32.mrf.mxu0 }
 0x3d5   :  { %4111 = vtanh.f32 %v2865_v60  ;;  %v2867_v58 = vadd.f32 %v2866_v62, %v2794_v61  ;;  %v2798_v36 = vadd.f32 %v2797_v63, %v5430_v40  ;;  %v2870_v37 = vpop.f32.mrf.mxu1 }
 0x3d6   :  { %v2799_v41 = vpop.f32.mrf.mxu0 }
 0x3d7   :  { %4113 = vtanh.f32 %v2867_v58  ;;  %v2871_v47 = vadd.f32 %v2870_v37, %v2798_v36  ;;  %v2800_v7 = vadd.f32 %v2799_v41, %v5433_v42  ;;  %v2872_v8 = vpop.f32.mrf.mxu1 }
 0x3d8   :  { %v2801_v17 = vpop.f32.mrf.mxu0 }
 0x3d9   :  { %4115 = vtanh.f32 %v2871_v47  ;;  %v2873_v22 = vadd.f32 %v2872_v8, %v2800_v7  ;;  %v2802_v26 = vadd.f32 %v2801_v17, %v5430_v40  ;;  %v2874_v16 = vpop.f32.mrf.mxu1 }
 0x3da   :  { %v2803_v52 = vpop.f32.mrf.mxu0 }
 0x3db   :  { %4117 = vtanh.f32 %v2873_v22  ;;  %v2875_v55 = vadd.f32 %v2874_v16, %v2802_v26  ;;  %v2804_v15 = vadd.f32 %v2803_v52, %v5433_v42  ;;  %v2876_v56 = vpop.f32.mrf.mxu1 }
 0x3dc   :  { %v2807_v0 = vpop.f32.mrf.mxu0 }
 0x3dd   :  { %4119 = vtanh.f32 %v2875_v55  ;;  %v2877_v1 = vadd.f32 %v2876_v56, %v2804_v15  ;;  %v2808_v54 = vadd.f32 %v2807_v0, %v5430_v40  ;;  %v2880_v2 = vpop.f32.mrf.mxu1 }
 0x3de   :  { %v4108_v3 = vpop.eup %4107  ;;  %v2809_v4 = vpop.f32.mrf.mxu0 }
 0x3df   :  { %3089 = vst [vmem:[#allocation3 + $0x20] sm:$0xff] %v4108_v3  ;;  %4121 = vtanh.f32 %v2877_v1  ;;  %v2881_v57 = vadd.f32 %v2880_v2, %v2808_v54  ;;  %v2810_v9 = vadd.f32 %v2809_v4, %v5433_v42  ;;  %v2882_v10 = vpop.f32.mrf.mxu1 }
 0x3e0   :  { %v4110_v11 = vpop.eup %4109  ;;  %v2811_v12 = vpop.f32.mrf.mxu0 }
 0x3e1   :  { %3090 = vst [vmem:[#allocation3 + $0x28] sm:$0xff] %v4110_v11  ;;  %4123 = vtanh.f32 %v2881_v57  ;;  %v2883_v13 = vadd.f32 %v2882_v10, %v2810_v9  ;;  %v2812_v23 = vadd.f32 %v2811_v12, %v5430_v40  ;;  %v2884_v24 = vpop.f32.mrf.mxu1 }
 0x3e2   :  { %v4112_v29 = vpop.eup %4111  ;;  %v2813_v30 = vpop.f32.mrf.mxu0 }
 0x3e3   :  { %3097 = vst [vmem:[#allocation3 + $0x58] sm:$0xff] %v4112_v29  ;;  %4125 = vtanh.f32 %v2883_v13  ;;  %v2885_v21 = vadd.f32 %v2884_v24, %v2812_v23  ;;  %v2814_v31 = vadd.f32 %v2813_v30, %v5433_v42  ;;  %v2886_v32 = vpop.f32.mrf.mxu1 }
 0x3e4   :  { %v4114_v33 = vpop.eup %4113  ;;  %v2817_v18 = vpop.f32.mrf.mxu0 }
 0x3e5   :  { %3098 = vst [vmem:[#allocation3 + $0x60] sm:$0xff] %v4114_v33  ;;  %4127 = vtanh.f32 %v2885_v21  ;;  %v2887_v34 = vadd.f32 %v2886_v32, %v2814_v31  ;;  %v2818_v5 = vadd.f32 %v2817_v18, %v5430_v40  ;;  %v2890_v20 = vpop.f32.mrf.mxu1 }
 0x3e6   :  { %v4116_v35 = vpop.eup %4115  ;;  %v2819_v19 = vpop.f32.mrf.mxu0 }
 0x3e7   :  { %3104 = vst [vmem:[#allocation3 + $0x90] sm:$0xff] %v4116_v35  ;;  %4129 = vtanh.f32 %v2887_v34  ;;  %v2891_v6 = vadd.f32 %v2890_v20, %v2818_v5  ;;  %v2820_v38 = vadd.f32 %v2819_v19, %v5433_v42  ;;  %v2892_v39 = vpop.f32.mrf.mxu1 }
 0x3e8   :  { %v4118_v43 = vpop.eup %4117  ;;  %v2821_v27 = vpop.f32.mrf.mxu0 }
 0x3e9   :  { %3105 = vst [vmem:[#allocation3 + $0x98] sm:$0xff] %v4118_v43  ;;  %4131 = vtanh.f32 %v2891_v6  ;;  %v2893_v44 = vadd.f32 %v2892_v39, %v2820_v38  ;;  %v2822_v28 = vadd.f32 %v2821_v27, %v5430_v40  ;;  %v2894_v46 = vpop.f32.mrf.mxu1  ;;  %v5453_v40 = vrot.slane %v5374_v53, %v1300_v50 }
 0x3ea   :  { %v4120_v48 = vpop.eup %4119  ;;  %v2823_v49 = vpop.f32.mrf.mxu0 }
 0x3eb   :  { %3111 = vst [vmem:[#allocation3 + $0xc8] sm:$0xff] %v4120_v48  ;;  %4133 = vtanh.f32 %v2893_v44  ;;  %v2895_v25 = vadd.f32 %v2894_v46, %v2822_v28  ;;  %v2824_v51 = vadd.f32 %v2823_v49, %v5433_v42  ;;  %v2896_v45 = vpop.f32.mrf.mxu1 }
 0x3ec   :  { %v4122_v59 = vpop.eup %4121 }
 0x3ed   :  { %3112 = vst [vmem:[#allocation3 + $0xd0] sm:$0xff] %v4122_v59  ;;  %4135 = vtanh.f32 %v2895_v25  ;;  %v2897_v60 = vadd.f32 %v2896_v45, %v2824_v51  ;;  %v3502_v61 = vpop.f32.mrf.mxu0 }
 0x3ee   :  { %v4124_v62 = vpop.eup %4123  ;;  %v3542_v63 = vpop.f32.mrf.mxu1 }
 0x3ef   :  { %3118 = vst [vmem:[#allocation3 + $0x100] sm:$0xff] %v4124_v62  ;;  %4137 = vtanh.f32 %v2897_v60  ;;  %v3503_v58 = vpop.f32.mrf.mxu0 }
 0x3f0   :  { %v4126_v14 = vpop.eup %4125  ;;  %v3504_v36 = vadd.f32 %v3503_v58, %v3502_v61  ;;  %v3543_v37 = vpop.f32.mrf.mxu1 }
 0x3f1   :  { %3119 = vst [vmem:[#allocation3 + $0x108] sm:$0xff] %v4126_v14  ;;  %v3505_v41 = vpop.f32.mrf.mxu0  ;;  %v3544_v7 = vadd.f32 %v3543_v37, %v3542_v63 }
 0x3f2   :  { %v4128_v42 = vpop.eup %4127  ;;  %v2934_v47 = vadd.f32 %v3504_v36, %v5453_v40  ;;  %v3545_v8 = vpop.f32.mrf.mxu1 }
 0x3f3   :  { %3125 = vst [vmem:[#allocation3 + $0x138] sm:$0xff] %v4128_v42  ;;  %v3506_v17 = vpop.f32.mrf.mxu0 }
 0x3f4   :  { %v4130_v22 = vpop.eup %4129  ;;  %v2999_v26 = vadd.f32 %v3544_v7, %v2934_v47  ;;  %v3507_v16 = vadd.f32 %v3506_v17, %v3505_v41  ;;  %v3546_v53 = vpop.f32.mrf.mxu1 }
 0x3f5   :  { %3126 = vst [vmem:[#allocation3 + $0x140] sm:$0xff] %v4130_v22  ;;  %v3508_v52 = vpop.f32.mrf.mxu0  ;;  %v3547_v56 = vadd.f32 %v3546_v53, %v3545_v8 }
 0x3f6   :  { %v4132_v55 = vpop.eup %4131  ;;  %4139 = vtanh.f32 %v2999_v26  ;;  %v2937_v15 = vadd.f32 %v3507_v16, %v5453_v40  ;;  %v3548_v0 = vpop.f32.mrf.mxu1 }
 0x3f7   :  { %3132 = vst [vmem:[#allocation3 + $0x170] sm:$0xff] %v4132_v55  ;;  %v3509_v1 = vpop.f32.mrf.mxu0 }
 0x3f8   :  { %v4134_v54 = vpop.eup %4133  ;;  %v3002_v2 = vadd.f32 %v3547_v56, %v2937_v15  ;;  %v3510_v3 = vadd.f32 %v3509_v1, %v3508_v52  ;;  %v3549_v4 = vpop.f32.mrf.mxu1 }
 0x3f9   :  { %3133 = vst [vmem:[#allocation3 + $0x178] sm:$0xff] %v4134_v54  ;;  %v3511_v57 = vpop.f32.mrf.mxu0  ;;  %v3550_v11 = vadd.f32 %v3549_v4, %v3548_v0 }
 0x3fa   :  { %v4136_v9 = vpop.eup %4135  ;;  %4141 = vtanh.f32 %v3002_v2  ;;  %v2942_v10 = vadd.f32 %v3510_v3, %v5453_v40  ;;  %v3551_v12 = vpop.f32.mrf.mxu1 }
 0x3fb   :  { %3139 = vst [vmem:[#allocation3 + $0x1a8] sm:$0xff] %v4136_v9  ;;  %v3512_v13 = vpop.f32.mrf.mxu0 }
 0x3fc   :  { %v4138_v23 = vpop.eup %4137  ;;  %v3007_v24 = vadd.f32 %v3550_v11, %v2942_v10  ;;  %v3513_v29 = vadd.f32 %v3512_v13, %v3511_v57  ;;  %v3552_v30 = vpop.f32.mrf.mxu1 }
 0x3fd   :  { %3140 = vst [vmem:[#allocation3 + $0x1b0] sm:$0xff] %v4138_v23  ;;  %v3514_v21 = vpop.f32.mrf.mxu0  ;;  %v3553_v32 = vadd.f32 %v3552_v30, %v3551_v12 }
 0x3fe   :  { %4143 = vtanh.f32 %v3007_v24  ;;  %v2945_v31 = vadd.f32 %v3513_v29, %v5453_v40  ;;  %v3554_v33 = vpop.f32.mrf.mxu1 }
 0x3ff   :  { %v3515_v18 = vpop.f32.mrf.mxu0 }
 0x400   :  { %v3010_v34 = vadd.f32 %v3553_v32, %v2945_v31  ;;  %v3516_v5 = vadd.f32 %v3515_v18, %v3514_v21  ;;  %v3555_v20 = vpop.f32.mrf.mxu1 }
 0x401   :  { %v3517_v35 = vpop.f32.mrf.mxu0  ;;  %v3556_v6 = vadd.f32 %v3555_v20, %v3554_v33 }
 0x402   :  { %4145 = vtanh.f32 %v3010_v34  ;;  %v2950_v19 = vadd.f32 %v3516_v5, %v5453_v40  ;;  %v3557_v38 = vpop.f32.mrf.mxu1 }
 0x403   :  { %v4140_v39 = vpop.eup %4139  ;;  %v3518_v43 = vpop.f32.mrf.mxu0 }
 0x404   :  { %3092 = vst.msk [vmem:[#allocation3 + $0x30] sm:$0xff] %vm3091_vm1, %v4140_v39  ;;  %v3015_v27 = vadd.f32 %v3556_v6, %v2950_v19  ;;  %v3519_v44 = vadd.f32 %v3518_v43, %v3517_v35  ;;  %v3558_v28 = vpop.f32.mrf.mxu1 }
 0x405   :  { %v3520_v46 = vpop.f32.mrf.mxu0  ;;  %v3559_v49 = vadd.f32 %v3558_v28, %v3557_v38 }
 0x406   :  { %4147 = vtanh.f32 %v3015_v27  ;;  %v2953_v48 = vadd.f32 %v3519_v44, %v5453_v40  ;;  %v3560_v50 = vpop.f32.mrf.mxu1 }
 0x407   :  { %v4142_v25 = vpop.eup %4141  ;;  %v3521_v51 = vpop.f32.mrf.mxu0 }
 0x408   :  { %3099 = vst.msk [vmem:[#allocation3 + $0x68] sm:$0xff] %vm3091_vm1, %v4142_v25  ;;  %v3018_v45 = vadd.f32 %v3559_v49, %v2953_v48  ;;  %v3522_v59 = vadd.f32 %v3521_v51, %v3520_v46  ;;  %v3561_v60 = vpop.f32.mrf.mxu1 }
 0x409   :  { %v3523_v61 = vpop.f32.mrf.mxu0  ;;  %v3562_v63 = vadd.f32 %v3561_v60, %v3560_v50 }
 0x40a   :  { %4149 = vtanh.f32 %v3018_v45  ;;  %v2958_v62 = vadd.f32 %v3522_v59, %v5453_v40  ;;  %v3563_v58 = vpop.f32.mrf.mxu1 }
 0x40b   :  { %v4144_v14 = vpop.eup %4143  ;;  %v3524_v36 = vpop.f32.mrf.mxu0 }
 0x40c   :  { %3106 = vst.msk [vmem:[#allocation3 + $0xa0] sm:$0xff] %vm3091_vm1, %v4144_v14  ;;  %v3023_v37 = vadd.f32 %v3562_v63, %v2958_v62  ;;  %v3525_v41 = vadd.f32 %v3524_v36, %v3523_v61  ;;  %v3564_v42 = vpop.f32.mrf.mxu1 }
 0x40d   :  { %v3565_v7 = vadd.f32 %v3564_v42, %v3563_v58 }
 0x40e   :  { %4151 = vtanh.f32 %v3023_v37  ;;  %v2961_v47 = vadd.f32 %v3525_v41, %v5453_v40 }
 0x40f   :  { %v4146_v8 = vpop.eup %4145 }
 0x410   :  { %3113 = vst.msk [vmem:[#allocation3 + $0xd8] sm:$0xff] %vm3091_vm1, %v4146_v8  ;;  %v3026_v17 = vadd.f32 %v3565_v7, %v2961_v47 }
 0x412   :  { %4153 = vtanh.f32 %v3026_v17 }
 0x413   :  { %v4148_v22 = vpop.eup %4147 }
 0x414   :  { %3120 = vst.msk [vmem:[#allocation3 + $0x110] sm:$0xff] %vm3091_vm1, %v4148_v22 }
 0x417   :  { %v4150_v26 = vpop.eup %4149 }
 0x418   :  { %3127 = vst.msk [vmem:[#allocation3 + $0x148] sm:$0xff] %vm3091_vm1, %v4150_v26 }
 0x41b   :  { %v4152_v16 = vpop.eup %4151 }
 0x41c   :  { %3134 = vst.msk [vmem:[#allocation3 + $0x180] sm:$0xff] %vm3091_vm1, %v4152_v16 }
 0x41f   :  { %v4154_v53 = vpop.eup %4153 }
 0x420   :  { %3141 = vst.msk [vmem:[#allocation3 + $0x1b8] sm:$0xff] %vm3091_vm1, %v4154_v53 }
 0x421   :  { %4166 = shalt.err (!%p4163_p4)
}
 0x422   :  { %s4180_s11 = smov 896   ;;  %s4181_s12 = smov 56  }
 0x423   :  { %3153 = dma.vmem_to_hbm [thread:$0]  %s3148_s9, 7168, %s5480_s6, [#allocation4], %s4180_s11, %s4180_s11, %s4181_s12  }
 0x424   :  { %4175 = dma.done.wait [#allocation4], 7168  }
 0x425   :  { %4176 = vsyncadd [#allocation4], 4294960128 }
 0x426   :  { %3157 = vsyncpa [#allocation4], 1 }

</bundles_post_ra>
